<compile_context>
chip_gen: v7x
topology: tpu7x:2x2x1
jax: 0.10.0
libtpu: 0.0.40
codegen_flags: <defaults>
</compile_context>

<pallas_src>
import jax
import jax.numpy as jnp
import numpy as np
from jax.experimental import pallas as pl
from jax.experimental.pallas import tpu as pltpu


# --------------------------------------------------------------------------
# Static helpers (plain numpy, built once in the wrapper).
# --------------------------------------------------------------------------
def _interp_matrix(out_size, in_size):
    """1-D weights of F.interpolate(mode='bilinear', align_corners=False)."""
    a = np.zeros((out_size, in_size), np.float32)
    scale = in_size / out_size
    for i in range(out_size):
        src = max((i + 0.5) * scale - 0.5, 0.0)
        i0 = min(int(np.floor(src)), in_size - 1)
        i1 = min(i0 + 1, in_size - 1)
        frac = src - i0
        a[i, i0] += 1.0 - frac
        a[i, i1] += frac
    return a


def _tap_masks(h, w, bt):
    """(9, 1, bt*h*w) validity masks for the 3x3 / padding=1 taps.

    With the depthwise conv expressed as flat-lane rolls, a roll by dy*w+dx
    wraps across row / image boundaries; these masks zero exactly the wrapped
    positions so zero-padding semantics are preserved."""
    masks = np.zeros((9, h, w), np.float32)
    t = 0
    for dy in (-1, 0, 1):
        for dx in (-1, 0, 1):
            yv = (np.arange(h) + dy >= 0) & (np.arange(h) + dy < h)
            xv = (np.arange(w) + dx >= 0) & (np.arange(w) + dx < w)
            masks[t] = (yv[:, None] & xv[None, :]).astype(np.float32)
            t += 1
    masks = masks.reshape(9, 1, h * w)
    return np.tile(masks, (1, 1, bt))           # same pattern per image in the step


# --------------------------------------------------------------------------
# Wrapper: parameter folding + fused pallas_call.
# --------------------------------------------------------------------------
def mixres_attention_pallas(high_res_x, low_res_x, params, bt=None):
    b, ch, hh, wh = high_res_x.shape
    _, cl, hl, wl = low_res_x.shape
    assert wh == hh, "MixResAttention's Q @ K^T requires a square high-res map"
    nh, nl = hh * wh, hl * wl

    # Batch elements per grid step (largest divisor of B up to 16).  For very
    # large batches keep >= 2 steps so v7x's two TensorCores both get work.
    if bt is None:
        bt = next(c for c in range(min(b, 16), 0, -1) if b % c == 0)
    assert b % bt == 0
    steps = b // bt

    (wdq, bdq, wdk, bdk, wdv, bdv,
     wpq, bpq, wpk, bpk, wpv, bpv,
     w_htl, bn_gamma, bn_beta, bn_mean, bn_var) = params

    # ---- parameter folding (tiny, wrapper-side) ----------------------------
    scale = 1.0 / float(np.sqrt(cl))
    wq_eff = wpq * scale                                   # fold attention scale into Q
    bq_eff = ((wpq @ bdq + bpq) * scale).reshape(ch, 1)    # + fold depthwise bias
    bk_eff = (wpk @ bdk + bpk).reshape(cl, 1)
    bv_eff = (wpv @ bdv + bpv).reshape(cl, 1)
    # TODO(synk): BatchNorm is folded in inference mode (running stats); the
    # train-mode batch-statistics path of high_to_low is not implemented.
    inv = bn_gamma / jnp.sqrt(bn_var + 1e-5)
    whtl_eff = w_htl * inv[:, None]
    bhtl_eff = (bn_beta - bn_mean * inv).reshape(cl, 1)

    # depthwise tap weights -> (9, C, 1): leading-axis indexed inside the kernel
    wdwq = jnp.transpose(wdq.reshape(ch, 9))[:, :, None]
    wdwk = jnp.transpose(wdk.reshape(cl, 9))[:, :, None]
    wdwv = jnp.transpose(wdv.reshape(cl, 9))[:, :, None]

    # Bilinear upsample absorbed into Q: Qp = Q @ U, so K is never upsampled.
    # TODO(synk): for very large feature maps replace the kron U (Nh, Nl) by
    # the separable (A_row, A_col) pair to keep the resident matrix O(H*W).
    u = jnp.asarray(np.kron(_interp_matrix(hh, hl), _interp_matrix(hh, wl)))  # (nh, nl)

    mask_h = jnp.asarray(_tap_masks(hh, wh, bt))           # (9, 1, bt*nh)
    mask_l = jnp.asarray(_tap_masks(hl, wl, bt))           # (9, 1, bt*nl)

    # channels-first, lane-dense (C, B*N) layouts
    xh2 = jnp.transpose(high_res_x.reshape(b, ch, nh), (1, 0, 2)).reshape(ch, b * nh)
    xl2 = jnp.transpose(low_res_x.reshape(b, cl, nl), (1, 0, 2)).reshape(cl, b * nl)

    f32 = jnp.float32

    def dwconv(x, w9_ref, m_ref, width):
        """3x3 depthwise conv on a (C, bt*H*W) slab via rolls + masks + VPU MAC."""
        lane = x.shape[-1]
        acc = jnp.zeros(x.shape, f32)
        t = 0
        for dy in (-1, 0, 1):
            for dx in (-1, 0, 1):
                d = dy * width + dx
                s = x if d == 0 else pltpu.roll(x, shift=(-d) % lane, axis=1)
                if d == 0:                               # center tap: no mask needed
                    acc = acc + w9_ref[t] * s
                else:
                    acc = acc + w9_ref[t] * (m_ref[t] * s)
                t += 1
        return acc

    def kernel(xh_ref, xl_ref, mh_ref, ml_ref,
               wdwq_ref, wdwk_ref, wdwv_ref,
               wq_ref, bq_ref, wk_ref, bk_ref, wv_ref, bv_ref,
               u_ref, whtl_ref, bhtl_ref, out_ref):
        xh = xh_ref[...]                                  # (Ch, bt*nh)
        xl = xl_ref[...]                                  # (Cl, bt*nl)

        # depthwise 3x3 (biases already folded into the pointwise biases)
        qd = dwconv(xh, wdwq_ref, mh_ref, wh)
        kd = dwconv(xl, wdwk_ref, ml_ref, wl)
        vd = dwconv(xl, wdwv_ref, ml_ref, wl)

        # pointwise 1x1 convs: single matmuls over the bt*N-wide lane axis
        q = jnp.dot(wq_ref[...], qd, preferred_element_type=f32) + bq_ref[...]
        k = jnp.dot(wk_ref[...], kd, preferred_element_type=f32) + bk_ref[...]
        v = jnp.dot(wv_ref[...], vd, preferred_element_type=f32) + bv_ref[...]

        u_m = u_ref[...]                                  # (nh, nl)
        whtl = whtl_ref[...]                              # (Cl, Ch)
        bhtl = bhtl_ref[...]                              # (Cl, 1)

        for bb in range(bt):                              # static unroll, tiny per image
            q_b = q[:, bb * nh:(bb + 1) * nh]             # (Ch, nh)
            k_b = k[:, bb * nl:(bb + 1) * nl]             # (Cl, nl)
            v_b = v[:, bb * nl:(bb + 1) * nl]             # (Cl, nl)

            # upsample absorbed into Q, then channel-attention scores (Ch, Cl)
            qp = jnp.dot(q_b, u_m, preferred_element_type=f32)            # (Ch, nl)
            s = jax.lax.dot_general(qp, k_b, (((1,), (1,)), ((), ())),
                                    preferred_element_type=f32)           # (Ch, Cl)
            m = jnp.max(s, axis=-1, keepdims=True)
            e = jnp.exp(s - m)
            p = e / jnp.sum(e, axis=-1, keepdims=True)                    # softmax

            # high_to_low (1x1 conv + folded BN) applied to the tiny prob matrix
            pw = jnp.dot(whtl, p, preferred_element_type=f32)             # (Cl, Cl)
            o_b = jnp.dot(pw, v_b, preferred_element_type=f32) + bhtl     # (Cl, nl)
            out_ref[:, bb * nl:(bb + 1) * nl] = o_b.astype(out_ref.dtype)

    def resident(shape):                 # weights / masks: constant block index
        n = len(shape)
        return pl.BlockSpec(shape, lambda i: (0,) * n)

    out2 = pl.pallas_call(
        kernel,
        out_shape=jax.ShapeDtypeStruct((cl, b * nl), high_res_x.dtype),
        grid=(steps,),
        in_specs=[
            pl.BlockSpec((ch, bt * nh), lambda i: (0, i)),
            pl.BlockSpec((cl, bt * nl), lambda i: (0, i)),
            resident((9, 1, bt * nh)), resident((9, 1, bt * nl)),
            resident((9, ch, 1)), resident((9, cl, 1)), resident((9, cl, 1)),
            resident((ch, ch)), resident((ch, 1)),
            resident((cl, cl)), resident((cl, 1)),
            resident((cl, cl)), resident((cl, 1)),
            resident((nh, nl)),
            resident((cl, ch)), resident((cl, 1)),
        ],
        out_specs=pl.BlockSpec((cl, bt * nl), lambda i: (0, i)),
        compiler_params=pltpu.CompilerParams(dimension_semantics=("parallel",)),
    )(xh2, xl2, mask_h, mask_l, wdwq, wdwk, wdwv,
      wq_eff, bq_eff, wpk, bk_eff, wpv, bv_eff, u, whtl_eff, bhtl_eff)

    out = jnp.transpose(out2.reshape(cl, b, nl), (1, 0, 2))
    return out.reshape(b, cl, hl, wl)


# --------------------------------------------------------------------------
# Pure-JAX reference mirroring the PyTorch forward (for validation).
# --------------------------------------------------------------------------
def mixres_attention_ref(high_res_x, low_res_x, params):
    (wdq, bdq, wdk, bdk, wdv, bdv,
     wpq, bpq, wpk, bpk, wpv, bpv,
     w_htl, bn_gamma, bn_beta, bn_mean, bn_var) = params
    b, ch, hh, wh = high_res_x.shape
    _, cl, hl, wl = low_res_x.shape

    def dwconv(x, w, bias):
        y = jax.lax.conv_general_dilated(
            x, w, window_strides=(1, 1), padding=((1, 1), (1, 1)),
            dimension_numbers=("NCHW", "OIHW", "NCHW"),
            feature_group_count=x.shape[1], precision="highest")
        return y + bias[None, :, None, None]

    def pwconv(x, w, bias):
        y = jnp.einsum("oc,bchw->bohw", w, x, precision="highest")
        return y + bias[None, :, None, None]

    q = pwconv(dwconv(high_res_x, wdq, bdq), wpq, bpq)
    k = pwconv(dwconv(low_res_x, wdk, bdk), wpk, bpk)
    v = pwconv(dwconv(low_res_x, wdv, bdv), wpv, bpv)

    # F.interpolate(K, size=(hh, hh), mode='bilinear', align_corners=False)
    a_h = jnp.asarray(_interp_matrix(hh, hl))
    a_w = jnp.asarray(_interp_matrix(hh, wl))
    k_up = jnp.einsum("iy,bcyx,jx->bcij", a_h, k, a_w, precision="highest")

    qf = q.reshape(b, ch, hh * wh)
    kf = k_up.reshape(b, cl, hh * hh)
    vf = v.reshape(b, cl, hl * wl)
    scores = jnp.einsum("bqn,bkn->bqk", qf, kf, precision="highest")
    scores = scores / jnp.sqrt(jnp.float32(cl))
    probs = jax.nn.softmax(scores, axis=-1)
    out = jnp.einsum("bqk,bkn->bqn", probs, vf, precision="highest")
    out = out.reshape(b, ch, hl, wl)

    # high_to_low: 1x1 conv (bias=False) + BatchNorm2d (inference, no ReLU).
    out = jnp.einsum("oc,bchw->bohw", w_htl, out, precision="highest")
    inv = bn_gamma / jnp.sqrt(bn_var + 1e-5)
    return out * inv[None, :, None, None] + (bn_beta - bn_mean * inv)[None, :, None, None]


if __name__ == "__main__":
    B, CH, CL = 2, 8, 8
    HH = WH = 16          # high-res spatial (must be square for this module)
    HL = WL = 8           # low-res spatial
    key = jax.random.PRNGKey(0)
    ks = list(jax.random.split(key, 19))

    def w(shape, kk, s=1.0):
        return jax.random.normal(kk, shape, jnp.float32) * s

    params = (
        w((CH, 1, 3, 3), ks[0], 0.3), w((CH,), ks[1], 0.1),       # dwConv_Q
        w((CL, 1, 3, 3), ks[2], 0.3), w((CL,), ks[3], 0.1),       # dwConv_K
        w((CL, 1, 3, 3), ks[4], 0.3), w((CL,), ks[5], 0.1),       # dwConv_V
        w((CH, CH), ks[6], CH ** -0.5), w((CH,), ks[7], 0.1),     # pwConv_Q
        w((CL, CL), ks[8], CL ** -0.5), w((CL,), ks[9], 0.1),     # pwConv_K
        w((CL, CL), ks[10], CL ** -0.5), w((CL,), ks[11], 0.1),   # pwConv_V
        w((CL, CH), ks[12], CH ** -0.5),                          # high_to_low conv
        1.0 + 0.1 * w((CL,), ks[13]),                             # BN gamma
        w((CL,), ks[14], 0.1),                                    # BN beta
        w((CL,), ks[15], 0.1),                                    # BN running_mean
        0.5 + jax.random.uniform(ks[16], (CL,), jnp.float32),     # BN running_var
    )

    high_x = jax.random.normal(ks[17], (B, CH, HH, WH), jnp.float32)
    low_x = jax.random.normal(ks[18], (B, CL, HL, WL), jnp.float32)

    out = mixres_attention_pallas(high_x, low_x, params)
    out = jax.block_until_ready(out)

    ref = mixres_attention_ref(high_x, low_x, params)
    assert out.shape == (B, CL, HL, WL)
    err = float(jnp.max(jnp.abs(out - ref)))
    assert jnp.allclose(out, ref, rtol=1e-2, atol=1e-2), err

    print("KERNEL_OK")
</pallas_src>

<mosaic_0001>
module attributes {stable_mosaic.version = 11 : i64} {
  func.func @kernel(%arg0: i32, %arg1: memref<8x512xf32, #tpu.memory_space<vmem>>, %arg2: memref<8x128xf32, #tpu.memory_space<vmem>>, %arg3: memref<9x1x512xf32, #tpu.memory_space<vmem>>, %arg4: memref<9x1x128xf32, #tpu.memory_space<vmem>>, %arg5: memref<9x8x1xf32, #tpu.memory_space<vmem>>, %arg6: memref<9x8x1xf32, #tpu.memory_space<vmem>>, %arg7: memref<9x8x1xf32, #tpu.memory_space<vmem>>, %arg8: memref<8x8xf32, #tpu.memory_space<vmem>>, %arg9: memref<8x1xf32, #tpu.memory_space<vmem>>, %arg10: memref<8x8xf32, #tpu.memory_space<vmem>>, %arg11: memref<8x1xf32, #tpu.memory_space<vmem>>, %arg12: memref<8x8xf32, #tpu.memory_space<vmem>>, %arg13: memref<8x1xf32, #tpu.memory_space<vmem>>, %arg14: memref<256x64xf32, #tpu.memory_space<vmem>>, %arg15: memref<8x8xf32, #tpu.memory_space<vmem>>, %arg16: memref<8x1xf32, #tpu.memory_space<vmem>>, %arg17: memref<8x128xf32, #tpu.memory_space<vmem>>) attributes {dimension_semantics = [#tpu.dimension_semantics<parallel>], iteration_bounds = array<i64: 1>, scalar_prefetch = 0 : i64, scratch_operands = 0 : i64, tpu.core_type = #tpu.core_type<tc>, window_params = [{transform_indices = @transform_0, window_bounds = array<i64: 8, 512>}, {transform_indices = @transform_1, window_bounds = array<i64: 8, 128>}, {pipeline_mode = #tpu.pipeline_mode<synchronous>, transform_indices = @transform_2, window_bounds = array<i64: 9, 1, 512>}, {pipeline_mode = #tpu.pipeline_mode<synchronous>, transform_indices = @transform_3, window_bounds = array<i64: 9, 1, 128>}, {pipeline_mode = #tpu.pipeline_mode<synchronous>, transform_indices = @transform_4, window_bounds = array<i64: 9, 8, 1>}, {pipeline_mode = #tpu.pipeline_mode<synchronous>, transform_indices = @transform_5, window_bounds = array<i64: 9, 8, 1>}, {pipeline_mode = #tpu.pipeline_mode<synchronous>, transform_indices = @transform_6, window_bounds = array<i64: 9, 8, 1>}, {pipeline_mode = #tpu.pipeline_mode<synchronous>, transform_indices = @transform_7, window_bounds = array<i64: 8, 8>}, {pipeline_mode = #tpu.pipeline_mode<synchronous>, transform_indices = @transform_8, window_bounds = array<i64: 8, 1>}, {pipeline_mode = #tpu.pipeline_mode<synchronous>, transform_indices = @transform_9, window_bounds = array<i64: 8, 8>}, {pipeline_mode = #tpu.pipeline_mode<synchronous>, transform_indices = @transform_10, window_bounds = array<i64: 8, 1>}, {pipeline_mode = #tpu.pipeline_mode<synchronous>, transform_indices = @transform_11, window_bounds = array<i64: 8, 8>}, {pipeline_mode = #tpu.pipeline_mode<synchronous>, transform_indices = @transform_12, window_bounds = array<i64: 8, 1>}, {pipeline_mode = #tpu.pipeline_mode<synchronous>, transform_indices = @transform_13, window_bounds = array<i64: 256, 64>}, {pipeline_mode = #tpu.pipeline_mode<synchronous>, transform_indices = @transform_14, window_bounds = array<i64: 8, 8>}, {pipeline_mode = #tpu.pipeline_mode<synchronous>, transform_indices = @transform_15, window_bounds = array<i64: 8, 1>}, {transform_indices = @transform_16, window_bounds = array<i64: 8, 128>}]} {
    %c0 = arith.constant 0 : index
    %c0_0 = arith.constant 0 : index
    %0 = vector.load %arg1[%c0, %c0_0] : memref<8x512xf32, #tpu.memory_space<vmem>>, vector<8x512xf32>
    %c0_1 = arith.constant 0 : index
    %c0_2 = arith.constant 0 : index
    %1 = vector.load %arg2[%c0_1, %c0_2] : memref<8x128xf32, #tpu.memory_space<vmem>>, vector<8x128xf32>
    %cst = arith.constant 0.000000e+00 : f32
    %2 = vector.broadcast %cst : f32 to vector<8x512xf32>
    %c17_i32 = arith.constant 17 : i32
    %3 = tpu.dynamic_rotate %0 by %c17_i32 dim 1 : vector<8x512xf32>, i32 -> vector<8x512xf32>
    %c0_3 = arith.constant 0 : index
    %c0_4 = arith.constant 0 : index
    %c0_5 = arith.constant 0 : index
    %4 = vector.load %arg5[%c0_3, %c0_4, %c0_5] : memref<9x8x1xf32, #tpu.memory_space<vmem>>, vector<1x8x1xf32>
    %5 = vector.shape_cast %4 : vector<1x8x1xf32> to vector<8x1xf32>
    %c0_6 = arith.constant 0 : index
    %c0_7 = arith.constant 0 : index
    %c0_8 = arith.constant 0 : index
    %6 = vector.load %arg3[%c0_6, %c0_7, %c0_8] : memref<9x1x512xf32, #tpu.memory_space<vmem>>, vector<1x1x512xf32>
    %7 = vector.shape_cast %6 : vector<1x1x512xf32> to vector<1x512xf32>
    %8 = vector.broadcast %7 : vector<1x512xf32> to vector<8x512xf32>
    %9 = arith.mulf %8, %3 : vector<8x512xf32>
    %10 = vector.broadcast %5 : vector<8x1xf32> to vector<8x512xf32>
    %11 = arith.mulf %10, %9 : vector<8x512xf32>
    %12 = arith.addf %2, %11 : vector<8x512xf32>
    %c16_i32 = arith.constant 16 : i32
    %13 = tpu.dynamic_rotate %0 by %c16_i32 dim 1 : vector<8x512xf32>, i32 -> vector<8x512xf32>
    %c1 = arith.constant 1 : index
    %c0_9 = arith.constant 0 : index
    %c0_10 = arith.constant 0 : index
    %14 = vector.load %arg5[%c1, %c0_9, %c0_10] : memref<9x8x1xf32, #tpu.memory_space<vmem>>, vector<1x8x1xf32>
    %15 = vector.shape_cast %14 : vector<1x8x1xf32> to vector<8x1xf32>
    %c1_11 = arith.constant 1 : index
    %c0_12 = arith.constant 0 : index
    %c0_13 = arith.constant 0 : index
    %16 = vector.load %arg3[%c1_11, %c0_12, %c0_13] : memref<9x1x512xf32, #tpu.memory_space<vmem>>, vector<1x1x512xf32>
    %17 = vector.shape_cast %16 : vector<1x1x512xf32> to vector<1x512xf32>
    %18 = vector.broadcast %17 : vector<1x512xf32> to vector<8x512xf32>
    %19 = arith.mulf %18, %13 : vector<8x512xf32>
    %20 = vector.broadcast %15 : vector<8x1xf32> to vector<8x512xf32>
    %21 = arith.mulf %20, %19 : vector<8x512xf32>
    %22 = arith.addf %12, %21 : vector<8x512xf32>
    %c15_i32 = arith.constant 15 : i32
    %23 = tpu.dynamic_rotate %0 by %c15_i32 dim 1 : vector<8x512xf32>, i32 -> vector<8x512xf32>
    %c2 = arith.constant 2 : index
    %c0_14 = arith.constant 0 : index
    %c0_15 = arith.constant 0 : index
    %24 = vector.load %arg5[%c2, %c0_14, %c0_15] : memref<9x8x1xf32, #tpu.memory_space<vmem>>, vector<1x8x1xf32>
    %25 = vector.shape_cast %24 : vector<1x8x1xf32> to vector<8x1xf32>
    %c2_16 = arith.constant 2 : index
    %c0_17 = arith.constant 0 : index
    %c0_18 = arith.constant 0 : index
    %26 = vector.load %arg3[%c2_16, %c0_17, %c0_18] : memref<9x1x512xf32, #tpu.memory_space<vmem>>, vector<1x1x512xf32>
    %27 = vector.shape_cast %26 : vector<1x1x512xf32> to vector<1x512xf32>
    %28 = vector.broadcast %27 : vector<1x512xf32> to vector<8x512xf32>
    %29 = arith.mulf %28, %23 : vector<8x512xf32>
    %30 = vector.broadcast %25 : vector<8x1xf32> to vector<8x512xf32>
    %31 = arith.mulf %30, %29 : vector<8x512xf32>
    %32 = arith.addf %22, %31 : vector<8x512xf32>
    %c1_i32 = arith.constant 1 : i32
    %33 = tpu.dynamic_rotate %0 by %c1_i32 dim 1 : vector<8x512xf32>, i32 -> vector<8x512xf32>
    %c3 = arith.constant 3 : index
    %c0_19 = arith.constant 0 : index
    %c0_20 = arith.constant 0 : index
    %34 = vector.load %arg5[%c3, %c0_19, %c0_20] : memref<9x8x1xf32, #tpu.memory_space<vmem>>, vector<1x8x1xf32>
    %35 = vector.shape_cast %34 : vector<1x8x1xf32> to vector<8x1xf32>
    %c3_21 = arith.constant 3 : index
    %c0_22 = arith.constant 0 : index
    %c0_23 = arith.constant 0 : index
    %36 = vector.load %arg3[%c3_21, %c0_22, %c0_23] : memref<9x1x512xf32, #tpu.memory_space<vmem>>, vector<1x1x512xf32>
    %37 = vector.shape_cast %36 : vector<1x1x512xf32> to vector<1x512xf32>
    %38 = vector.broadcast %37 : vector<1x512xf32> to vector<8x512xf32>
    %39 = arith.mulf %38, %33 : vector<8x512xf32>
    %40 = vector.broadcast %35 : vector<8x1xf32> to vector<8x512xf32>
    %41 = arith.mulf %40, %39 : vector<8x512xf32>
    %42 = arith.addf %32, %41 : vector<8x512xf32>
    %c4 = arith.constant 4 : index
    %c0_24 = arith.constant 0 : index
    %c0_25 = arith.constant 0 : index
    %43 = vector.load %arg5[%c4, %c0_24, %c0_25] : memref<9x8x1xf32, #tpu.memory_space<vmem>>, vector<1x8x1xf32>
    %44 = vector.shape_cast %43 : vector<1x8x1xf32> to vector<8x1xf32>
    %45 = vector.broadcast %44 : vector<8x1xf32> to vector<8x512xf32>
    %46 = arith.mulf %45, %0 : vector<8x512xf32>
    %47 = arith.addf %42, %46 : vector<8x512xf32>
    %c511_i32 = arith.constant 511 : i32
    %48 = tpu.dynamic_rotate %0 by %c511_i32 dim 1 : vector<8x512xf32>, i32 -> vector<8x512xf32>
    %c5 = arith.constant 5 : index
    %c0_26 = arith.constant 0 : index
    %c0_27 = arith.constant 0 : index
    %49 = vector.load %arg5[%c5, %c0_26, %c0_27] : memref<9x8x1xf32, #tpu.memory_space<vmem>>, vector<1x8x1xf32>
    %50 = vector.shape_cast %49 : vector<1x8x1xf32> to vector<8x1xf32>
    %c5_28 = arith.constant 5 : index
    %c0_29 = arith.constant 0 : index
    %c0_30 = arith.constant 0 : index
    %51 = vector.load %arg3[%c5_28, %c0_29, %c0_30] : memref<9x1x512xf32, #tpu.memory_space<vmem>>, vector<1x1x512xf32>
    %52 = vector.shape_cast %51 : vector<1x1x512xf32> to vector<1x512xf32>
    %53 = vector.broadcast %52 : vector<1x512xf32> to vector<8x512xf32>
    %54 = arith.mulf %53, %48 : vector<8x512xf32>
    %55 = vector.broadcast %50 : vector<8x1xf32> to vector<8x512xf32>
    %56 = arith.mulf %55, %54 : vector<8x512xf32>
    %57 = arith.addf %47, %56 : vector<8x512xf32>
    %c497_i32 = arith.constant 497 : i32
    %58 = tpu.dynamic_rotate %0 by %c497_i32 dim 1 : vector<8x512xf32>, i32 -> vector<8x512xf32>
    %c6 = arith.constant 6 : index
    %c0_31 = arith.constant 0 : index
    %c0_32 = arith.constant 0 : index
    %59 = vector.load %arg5[%c6, %c0_31, %c0_32] : memref<9x8x1xf32, #tpu.memory_space<vmem>>, vector<1x8x1xf32>
    %60 = vector.shape_cast %59 : vector<1x8x1xf32> to vector<8x1xf32>
    %c6_33 = arith.constant 6 : index
    %c0_34 = arith.constant 0 : index
    %c0_35 = arith.constant 0 : index
    %61 = vector.load %arg3[%c6_33, %c0_34, %c0_35] : memref<9x1x512xf32, #tpu.memory_space<vmem>>, vector<1x1x512xf32>
    %62 = vector.shape_cast %61 : vector<1x1x512xf32> to vector<1x512xf32>
    %63 = vector.broadcast %62 : vector<1x512xf32> to vector<8x512xf32>
    %64 = arith.mulf %63, %58 : vector<8x512xf32>
    %65 = vector.broadcast %60 : vector<8x1xf32> to vector<8x512xf32>
    %66 = arith.mulf %65, %64 : vector<8x512xf32>
    %67 = arith.addf %57, %66 : vector<8x512xf32>
    %c496_i32 = arith.constant 496 : i32
    %68 = tpu.dynamic_rotate %0 by %c496_i32 dim 1 : vector<8x512xf32>, i32 -> vector<8x512xf32>
    %c7 = arith.constant 7 : index
    %c0_36 = arith.constant 0 : index
    %c0_37 = arith.constant 0 : index
    %69 = vector.load %arg5[%c7, %c0_36, %c0_37] : memref<9x8x1xf32, #tpu.memory_space<vmem>>, vector<1x8x1xf32>
    %70 = vector.shape_cast %69 : vector<1x8x1xf32> to vector<8x1xf32>
    %c7_38 = arith.constant 7 : index
    %c0_39 = arith.constant 0 : index
    %c0_40 = arith.constant 0 : index
    %71 = vector.load %arg3[%c7_38, %c0_39, %c0_40] : memref<9x1x512xf32, #tpu.memory_space<vmem>>, vector<1x1x512xf32>
    %72 = vector.shape_cast %71 : vector<1x1x512xf32> to vector<1x512xf32>
    %73 = vector.broadcast %72 : vector<1x512xf32> to vector<8x512xf32>
    %74 = arith.mulf %73, %68 : vector<8x512xf32>
    %75 = vector.broadcast %70 : vector<8x1xf32> to vector<8x512xf32>
    %76 = arith.mulf %75, %74 : vector<8x512xf32>
    %77 = arith.addf %67, %76 : vector<8x512xf32>
    %c495_i32 = arith.constant 495 : i32
    %78 = tpu.dynamic_rotate %0 by %c495_i32 dim 1 : vector<8x512xf32>, i32 -> vector<8x512xf32>
    %c8 = arith.constant 8 : index
    %c0_41 = arith.constant 0 : index
    %c0_42 = arith.constant 0 : index
    %79 = vector.load %arg5[%c8, %c0_41, %c0_42] : memref<9x8x1xf32, #tpu.memory_space<vmem>>, vector<1x8x1xf32>
    %80 = vector.shape_cast %79 : vector<1x8x1xf32> to vector<8x1xf32>
    %c8_43 = arith.constant 8 : index
    %c0_44 = arith.constant 0 : index
    %c0_45 = arith.constant 0 : index
    %81 = vector.load %arg3[%c8_43, %c0_44, %c0_45] : memref<9x1x512xf32, #tpu.memory_space<vmem>>, vector<1x1x512xf32>
    %82 = vector.shape_cast %81 : vector<1x1x512xf32> to vector<1x512xf32>
    %83 = vector.broadcast %82 : vector<1x512xf32> to vector<8x512xf32>
    %84 = arith.mulf %83, %78 : vector<8x512xf32>
    %85 = vector.broadcast %80 : vector<8x1xf32> to vector<8x512xf32>
    %86 = arith.mulf %85, %84 : vector<8x512xf32>
    %87 = arith.addf %77, %86 : vector<8x512xf32>
    %cst_46 = arith.constant 0.000000e+00 : f32
    %88 = vector.broadcast %cst_46 : f32 to vector<8x128xf32>
    %c9_i32 = arith.constant 9 : i32
    %89 = tpu.dynamic_rotate %1 by %c9_i32 dim 1 : vector<8x128xf32>, i32 -> vector<8x128xf32>
    %c0_47 = arith.constant 0 : index
    %c0_48 = arith.constant 0 : index
    %c0_49 = arith.constant 0 : index
    %90 = vector.load %arg6[%c0_47, %c0_48, %c0_49] : memref<9x8x1xf32, #tpu.memory_space<vmem>>, vector<1x8x1xf32>
    %91 = vector.shape_cast %90 : vector<1x8x1xf32> to vector<8x1xf32>
    %c0_50 = arith.constant 0 : index
    %c0_51 = arith.constant 0 : index
    %c0_52 = arith.constant 0 : index
    %92 = vector.load %arg4[%c0_50, %c0_51, %c0_52] : memref<9x1x128xf32, #tpu.memory_space<vmem>>, vector<1x1x128xf32>
    %93 = vector.shape_cast %92 : vector<1x1x128xf32> to vector<1x128xf32>
    %94 = vector.broadcast %93 : vector<1x128xf32> to vector<8x128xf32>
    %95 = arith.mulf %94, %89 : vector<8x128xf32>
    %96 = vector.broadcast %91 : vector<8x1xf32> to vector<8x128xf32>
    %97 = arith.mulf %96, %95 : vector<8x128xf32>
    %98 = arith.addf %88, %97 : vector<8x128xf32>
    %c8_i32 = arith.constant 8 : i32
    %99 = tpu.dynamic_rotate %1 by %c8_i32 dim 1 : vector<8x128xf32>, i32 -> vector<8x128xf32>
    %c1_53 = arith.constant 1 : index
    %c0_54 = arith.constant 0 : index
    %c0_55 = arith.constant 0 : index
    %100 = vector.load %arg6[%c1_53, %c0_54, %c0_55] : memref<9x8x1xf32, #tpu.memory_space<vmem>>, vector<1x8x1xf32>
    %101 = vector.shape_cast %100 : vector<1x8x1xf32> to vector<8x1xf32>
    %c1_56 = arith.constant 1 : index
    %c0_57 = arith.constant 0 : index
    %c0_58 = arith.constant 0 : index
    %102 = vector.load %arg4[%c1_56, %c0_57, %c0_58] : memref<9x1x128xf32, #tpu.memory_space<vmem>>, vector<1x1x128xf32>
    %103 = vector.shape_cast %102 : vector<1x1x128xf32> to vector<1x128xf32>
    %104 = vector.broadcast %103 : vector<1x128xf32> to vector<8x128xf32>
    %105 = arith.mulf %104, %99 : vector<8x128xf32>
    %106 = vector.broadcast %101 : vector<8x1xf32> to vector<8x128xf32>
    %107 = arith.mulf %106, %105 : vector<8x128xf32>
    %108 = arith.addf %98, %107 : vector<8x128xf32>
    %c7_i32 = arith.constant 7 : i32
    %109 = tpu.dynamic_rotate %1 by %c7_i32 dim 1 : vector<8x128xf32>, i32 -> vector<8x128xf32>
    %c2_59 = arith.constant 2 : index
    %c0_60 = arith.constant 0 : index
    %c0_61 = arith.constant 0 : index
    %110 = vector.load %arg6[%c2_59, %c0_60, %c0_61] : memref<9x8x1xf32, #tpu.memory_space<vmem>>, vector<1x8x1xf32>
    %111 = vector.shape_cast %110 : vector<1x8x1xf32> to vector<8x1xf32>
    %c2_62 = arith.constant 2 : index
    %c0_63 = arith.constant 0 : index
    %c0_64 = arith.constant 0 : index
    %112 = vector.load %arg4[%c2_62, %c0_63, %c0_64] : memref<9x1x128xf32, #tpu.memory_space<vmem>>, vector<1x1x128xf32>
    %113 = vector.shape_cast %112 : vector<1x1x128xf32> to vector<1x128xf32>
    %114 = vector.broadcast %113 : vector<1x128xf32> to vector<8x128xf32>
    %115 = arith.mulf %114, %109 : vector<8x128xf32>
    %116 = vector.broadcast %111 : vector<8x1xf32> to vector<8x128xf32>
    %117 = arith.mulf %116, %115 : vector<8x128xf32>
    %118 = arith.addf %108, %117 : vector<8x128xf32>
    %c1_i32_65 = arith.constant 1 : i32
    %119 = tpu.dynamic_rotate %1 by %c1_i32_65 dim 1 : vector<8x128xf32>, i32 -> vector<8x128xf32>
    %c3_66 = arith.constant 3 : index
    %c0_67 = arith.constant 0 : index
    %c0_68 = arith.constant 0 : index
    %120 = vector.load %arg6[%c3_66, %c0_67, %c0_68] : memref<9x8x1xf32, #tpu.memory_space<vmem>>, vector<1x8x1xf32>
    %121 = vector.shape_cast %120 : vector<1x8x1xf32> to vector<8x1xf32>
    %c3_69 = arith.constant 3 : index
    %c0_70 = arith.constant 0 : index
    %c0_71 = arith.constant 0 : index
    %122 = vector.load %arg4[%c3_69, %c0_70, %c0_71] : memref<9x1x128xf32, #tpu.memory_space<vmem>>, vector<1x1x128xf32>
    %123 = vector.shape_cast %122 : vector<1x1x128xf32> to vector<1x128xf32>
    %124 = vector.broadcast %123 : vector<1x128xf32> to vector<8x128xf32>
    %125 = arith.mulf %124, %119 : vector<8x128xf32>
    %126 = vector.broadcast %121 : vector<8x1xf32> to vector<8x128xf32>
    %127 = arith.mulf %126, %125 : vector<8x128xf32>
    %128 = arith.addf %118, %127 : vector<8x128xf32>
    %c4_72 = arith.constant 4 : index
    %c0_73 = arith.constant 0 : index
    %c0_74 = arith.constant 0 : index
    %129 = vector.load %arg6[%c4_72, %c0_73, %c0_74] : memref<9x8x1xf32, #tpu.memory_space<vmem>>, vector<1x8x1xf32>
    %130 = vector.shape_cast %129 : vector<1x8x1xf32> to vector<8x1xf32>
    %131 = vector.broadcast %130 : vector<8x1xf32> to vector<8x128xf32>
    %132 = arith.mulf %131, %1 : vector<8x128xf32>
    %133 = arith.addf %128, %132 : vector<8x128xf32>
    %c127_i32 = arith.constant 127 : i32
    %134 = tpu.dynamic_rotate %1 by %c127_i32 dim 1 : vector<8x128xf32>, i32 -> vector<8x128xf32>
    %c5_75 = arith.constant 5 : index
    %c0_76 = arith.constant 0 : index
    %c0_77 = arith.constant 0 : index
    %135 = vector.load %arg6[%c5_75, %c0_76, %c0_77] : memref<9x8x1xf32, #tpu.memory_space<vmem>>, vector<1x8x1xf32>
    %136 = vector.shape_cast %135 : vector<1x8x1xf32> to vector<8x1xf32>
    %c5_78 = arith.constant 5 : index
    %c0_79 = arith.constant 0 : index
    %c0_80 = arith.constant 0 : index
    %137 = vector.load %arg4[%c5_78, %c0_79, %c0_80] : memref<9x1x128xf32, #tpu.memory_space<vmem>>, vector<1x1x128xf32>
    %138 = vector.shape_cast %137 : vector<1x1x128xf32> to vector<1x128xf32>
    %139 = vector.broadcast %138 : vector<1x128xf32> to vector<8x128xf32>
    %140 = arith.mulf %139, %134 : vector<8x128xf32>
    %141 = vector.broadcast %136 : vector<8x1xf32> to vector<8x128xf32>
    %142 = arith.mulf %141, %140 : vector<8x128xf32>
    %143 = arith.addf %133, %142 : vector<8x128xf32>
    %c121_i32 = arith.constant 121 : i32
    %144 = tpu.dynamic_rotate %1 by %c121_i32 dim 1 : vector<8x128xf32>, i32 -> vector<8x128xf32>
    %c6_81 = arith.constant 6 : index
    %c0_82 = arith.constant 0 : index
    %c0_83 = arith.constant 0 : index
    %145 = vector.load %arg6[%c6_81, %c0_82, %c0_83] : memref<9x8x1xf32, #tpu.memory_space<vmem>>, vector<1x8x1xf32>
    %146 = vector.shape_cast %145 : vector<1x8x1xf32> to vector<8x1xf32>
    %c6_84 = arith.constant 6 : index
    %c0_85 = arith.constant 0 : index
    %c0_86 = arith.constant 0 : index
    %147 = vector.load %arg4[%c6_84, %c0_85, %c0_86] : memref<9x1x128xf32, #tpu.memory_space<vmem>>, vector<1x1x128xf32>
    %148 = vector.shape_cast %147 : vector<1x1x128xf32> to vector<1x128xf32>
    %149 = vector.broadcast %148 : vector<1x128xf32> to vector<8x128xf32>
    %150 = arith.mulf %149, %144 : vector<8x128xf32>
    %151 = vector.broadcast %146 : vector<8x1xf32> to vector<8x128xf32>
    %152 = arith.mulf %151, %150 : vector<8x128xf32>
    %153 = arith.addf %143, %152 : vector<8x128xf32>
    %c120_i32 = arith.constant 120 : i32
    %154 = tpu.dynamic_rotate %1 by %c120_i32 dim 1 : vector<8x128xf32>, i32 -> vector<8x128xf32>
    %c7_87 = arith.constant 7 : index
    %c0_88 = arith.constant 0 : index
    %c0_89 = arith.constant 0 : index
    %155 = vector.load %arg6[%c7_87, %c0_88, %c0_89] : memref<9x8x1xf32, #tpu.memory_space<vmem>>, vector<1x8x1xf32>
    %156 = vector.shape_cast %155 : vector<1x8x1xf32> to vector<8x1xf32>
    %c7_90 = arith.constant 7 : index
    %c0_91 = arith.constant 0 : index
    %c0_92 = arith.constant 0 : index
    %157 = vector.load %arg4[%c7_90, %c0_91, %c0_92] : memref<9x1x128xf32, #tpu.memory_space<vmem>>, vector<1x1x128xf32>
    %158 = vector.shape_cast %157 : vector<1x1x128xf32> to vector<1x128xf32>
    %159 = vector.broadcast %158 : vector<1x128xf32> to vector<8x128xf32>
    %160 = arith.mulf %159, %154 : vector<8x128xf32>
    %161 = vector.broadcast %156 : vector<8x1xf32> to vector<8x128xf32>
    %162 = arith.mulf %161, %160 : vector<8x128xf32>
    %163 = arith.addf %153, %162 : vector<8x128xf32>
    %c119_i32 = arith.constant 119 : i32
    %164 = tpu.dynamic_rotate %1 by %c119_i32 dim 1 : vector<8x128xf32>, i32 -> vector<8x128xf32>
    %c8_93 = arith.constant 8 : index
    %c0_94 = arith.constant 0 : index
    %c0_95 = arith.constant 0 : index
    %165 = vector.load %arg6[%c8_93, %c0_94, %c0_95] : memref<9x8x1xf32, #tpu.memory_space<vmem>>, vector<1x8x1xf32>
    %166 = vector.shape_cast %165 : vector<1x8x1xf32> to vector<8x1xf32>
    %c8_96 = arith.constant 8 : index
    %c0_97 = arith.constant 0 : index
    %c0_98 = arith.constant 0 : index
    %167 = vector.load %arg4[%c8_96, %c0_97, %c0_98] : memref<9x1x128xf32, #tpu.memory_space<vmem>>, vector<1x1x128xf32>
    %168 = vector.shape_cast %167 : vector<1x1x128xf32> to vector<1x128xf32>
    %169 = vector.broadcast %168 : vector<1x128xf32> to vector<8x128xf32>
    %170 = arith.mulf %169, %164 : vector<8x128xf32>
    %171 = vector.broadcast %166 : vector<8x1xf32> to vector<8x128xf32>
    %172 = arith.mulf %171, %170 : vector<8x128xf32>
    %173 = arith.addf %163, %172 : vector<8x128xf32>
    %cst_99 = arith.constant 0.000000e+00 : f32
    %174 = vector.broadcast %cst_99 : f32 to vector<8x128xf32>
    %c9_i32_100 = arith.constant 9 : i32
    %175 = tpu.dynamic_rotate %1 by %c9_i32_100 dim 1 : vector<8x128xf32>, i32 -> vector<8x128xf32>
    %c0_101 = arith.constant 0 : index
    %c0_102 = arith.constant 0 : index
    %c0_103 = arith.constant 0 : index
    %176 = vector.load %arg7[%c0_101, %c0_102, %c0_103] : memref<9x8x1xf32, #tpu.memory_space<vmem>>, vector<1x8x1xf32>
    %177 = vector.shape_cast %176 : vector<1x8x1xf32> to vector<8x1xf32>
    %c0_104 = arith.constant 0 : index
    %c0_105 = arith.constant 0 : index
    %c0_106 = arith.constant 0 : index
    %178 = vector.load %arg4[%c0_104, %c0_105, %c0_106] : memref<9x1x128xf32, #tpu.memory_space<vmem>>, vector<1x1x128xf32>
    %179 = vector.shape_cast %178 : vector<1x1x128xf32> to vector<1x128xf32>
    %180 = vector.broadcast %179 : vector<1x128xf32> to vector<8x128xf32>
    %181 = arith.mulf %180, %175 : vector<8x128xf32>
    %182 = vector.broadcast %177 : vector<8x1xf32> to vector<8x128xf32>
    %183 = arith.mulf %182, %181 : vector<8x128xf32>
    %184 = arith.addf %174, %183 : vector<8x128xf32>
    %c8_i32_107 = arith.constant 8 : i32
    %185 = tpu.dynamic_rotate %1 by %c8_i32_107 dim 1 : vector<8x128xf32>, i32 -> vector<8x128xf32>
    %c1_108 = arith.constant 1 : index
    %c0_109 = arith.constant 0 : index
    %c0_110 = arith.constant 0 : index
    %186 = vector.load %arg7[%c1_108, %c0_109, %c0_110] : memref<9x8x1xf32, #tpu.memory_space<vmem>>, vector<1x8x1xf32>
    %187 = vector.shape_cast %186 : vector<1x8x1xf32> to vector<8x1xf32>
    %c1_111 = arith.constant 1 : index
    %c0_112 = arith.constant 0 : index
    %c0_113 = arith.constant 0 : index
    %188 = vector.load %arg4[%c1_111, %c0_112, %c0_113] : memref<9x1x128xf32, #tpu.memory_space<vmem>>, vector<1x1x128xf32>
    %189 = vector.shape_cast %188 : vector<1x1x128xf32> to vector<1x128xf32>
    %190 = vector.broadcast %189 : vector<1x128xf32> to vector<8x128xf32>
    %191 = arith.mulf %190, %185 : vector<8x128xf32>
    %192 = vector.broadcast %187 : vector<8x1xf32> to vector<8x128xf32>
    %193 = arith.mulf %192, %191 : vector<8x128xf32>
    %194 = arith.addf %184, %193 : vector<8x128xf32>
    %c7_i32_114 = arith.constant 7 : i32
    %195 = tpu.dynamic_rotate %1 by %c7_i32_114 dim 1 : vector<8x128xf32>, i32 -> vector<8x128xf32>
    %c2_115 = arith.constant 2 : index
    %c0_116 = arith.constant 0 : index
    %c0_117 = arith.constant 0 : index
    %196 = vector.load %arg7[%c2_115, %c0_116, %c0_117] : memref<9x8x1xf32, #tpu.memory_space<vmem>>, vector<1x8x1xf32>
    %197 = vector.shape_cast %196 : vector<1x8x1xf32> to vector<8x1xf32>
    %c2_118 = arith.constant 2 : index
    %c0_119 = arith.constant 0 : index
    %c0_120 = arith.constant 0 : index
    %198 = vector.load %arg4[%c2_118, %c0_119, %c0_120] : memref<9x1x128xf32, #tpu.memory_space<vmem>>, vector<1x1x128xf32>
    %199 = vector.shape_cast %198 : vector<1x1x128xf32> to vector<1x128xf32>
    %200 = vector.broadcast %199 : vector<1x128xf32> to vector<8x128xf32>
    %201 = arith.mulf %200, %195 : vector<8x128xf32>
    %202 = vector.broadcast %197 : vector<8x1xf32> to vector<8x128xf32>
    %203 = arith.mulf %202, %201 : vector<8x128xf32>
    %204 = arith.addf %194, %203 : vector<8x128xf32>
    %c1_i32_121 = arith.constant 1 : i32
    %205 = tpu.dynamic_rotate %1 by %c1_i32_121 dim 1 : vector<8x128xf32>, i32 -> vector<8x128xf32>
    %c3_122 = arith.constant 3 : index
    %c0_123 = arith.constant 0 : index
    %c0_124 = arith.constant 0 : index
    %206 = vector.load %arg7[%c3_122, %c0_123, %c0_124] : memref<9x8x1xf32, #tpu.memory_space<vmem>>, vector<1x8x1xf32>
    %207 = vector.shape_cast %206 : vector<1x8x1xf32> to vector<8x1xf32>
    %c3_125 = arith.constant 3 : index
    %c0_126 = arith.constant 0 : index
    %c0_127 = arith.constant 0 : index
    %208 = vector.load %arg4[%c3_125, %c0_126, %c0_127] : memref<9x1x128xf32, #tpu.memory_space<vmem>>, vector<1x1x128xf32>
    %209 = vector.shape_cast %208 : vector<1x1x128xf32> to vector<1x128xf32>
    %210 = vector.broadcast %209 : vector<1x128xf32> to vector<8x128xf32>
    %211 = arith.mulf %210, %205 : vector<8x128xf32>
    %212 = vector.broadcast %207 : vector<8x1xf32> to vector<8x128xf32>
    %213 = arith.mulf %212, %211 : vector<8x128xf32>
    %214 = arith.addf %204, %213 : vector<8x128xf32>
    %c4_128 = arith.constant 4 : index
    %c0_129 = arith.constant 0 : index
    %c0_130 = arith.constant 0 : index
    %215 = vector.load %arg7[%c4_128, %c0_129, %c0_130] : memref<9x8x1xf32, #tpu.memory_space<vmem>>, vector<1x8x1xf32>
    %216 = vector.shape_cast %215 : vector<1x8x1xf32> to vector<8x1xf32>
    %217 = vector.broadcast %216 : vector<8x1xf32> to vector<8x128xf32>
    %218 = arith.mulf %217, %1 : vector<8x128xf32>
    %219 = arith.addf %214, %218 : vector<8x128xf32>
    %c127_i32_131 = arith.constant 127 : i32
    %220 = tpu.dynamic_rotate %1 by %c127_i32_131 dim 1 : vector<8x128xf32>, i32 -> vector<8x128xf32>
    %c5_132 = arith.constant 5 : index
    %c0_133 = arith.constant 0 : index
    %c0_134 = arith.constant 0 : index
    %221 = vector.load %arg7[%c5_132, %c0_133, %c0_134] : memref<9x8x1xf32, #tpu.memory_space<vmem>>, vector<1x8x1xf32>
    %222 = vector.shape_cast %221 : vector<1x8x1xf32> to vector<8x1xf32>
    %c5_135 = arith.constant 5 : index
    %c0_136 = arith.constant 0 : index
    %c0_137 = arith.constant 0 : index
    %223 = vector.load %arg4[%c5_135, %c0_136, %c0_137] : memref<9x1x128xf32, #tpu.memory_space<vmem>>, vector<1x1x128xf32>
    %224 = vector.shape_cast %223 : vector<1x1x128xf32> to vector<1x128xf32>
    %225 = vector.broadcast %224 : vector<1x128xf32> to vector<8x128xf32>
    %226 = arith.mulf %225, %220 : vector<8x128xf32>
    %227 = vector.broadcast %222 : vector<8x1xf32> to vector<8x128xf32>
    %228 = arith.mulf %227, %226 : vector<8x128xf32>
    %229 = arith.addf %219, %228 : vector<8x128xf32>
    %c121_i32_138 = arith.constant 121 : i32
    %230 = tpu.dynamic_rotate %1 by %c121_i32_138 dim 1 : vector<8x128xf32>, i32 -> vector<8x128xf32>
    %c6_139 = arith.constant 6 : index
    %c0_140 = arith.constant 0 : index
    %c0_141 = arith.constant 0 : index
    %231 = vector.load %arg7[%c6_139, %c0_140, %c0_141] : memref<9x8x1xf32, #tpu.memory_space<vmem>>, vector<1x8x1xf32>
    %232 = vector.shape_cast %231 : vector<1x8x1xf32> to vector<8x1xf32>
    %c6_142 = arith.constant 6 : index
    %c0_143 = arith.constant 0 : index
    %c0_144 = arith.constant 0 : index
    %233 = vector.load %arg4[%c6_142, %c0_143, %c0_144] : memref<9x1x128xf32, #tpu.memory_space<vmem>>, vector<1x1x128xf32>
    %234 = vector.shape_cast %233 : vector<1x1x128xf32> to vector<1x128xf32>
    %235 = vector.broadcast %234 : vector<1x128xf32> to vector<8x128xf32>
    %236 = arith.mulf %235, %230 : vector<8x128xf32>
    %237 = vector.broadcast %232 : vector<8x1xf32> to vector<8x128xf32>
    %238 = arith.mulf %237, %236 : vector<8x128xf32>
    %239 = arith.addf %229, %238 : vector<8x128xf32>
    %c120_i32_145 = arith.constant 120 : i32
    %240 = tpu.dynamic_rotate %1 by %c120_i32_145 dim 1 : vector<8x128xf32>, i32 -> vector<8x128xf32>
    %c7_146 = arith.constant 7 : index
    %c0_147 = arith.constant 0 : index
    %c0_148 = arith.constant 0 : index
    %241 = vector.load %arg7[%c7_146, %c0_147, %c0_148] : memref<9x8x1xf32, #tpu.memory_space<vmem>>, vector<1x8x1xf32>
    %242 = vector.shape_cast %241 : vector<1x8x1xf32> to vector<8x1xf32>
    %c7_149 = arith.constant 7 : index
    %c0_150 = arith.constant 0 : index
    %c0_151 = arith.constant 0 : index
    %243 = vector.load %arg4[%c7_149, %c0_150, %c0_151] : memref<9x1x128xf32, #tpu.memory_space<vmem>>, vector<1x1x128xf32>
    %244 = vector.shape_cast %243 : vector<1x1x128xf32> to vector<1x128xf32>
    %245 = vector.broadcast %244 : vector<1x128xf32> to vector<8x128xf32>
    %246 = arith.mulf %245, %240 : vector<8x128xf32>
    %247 = vector.broadcast %242 : vector<8x1xf32> to vector<8x128xf32>
    %248 = arith.mulf %247, %246 : vector<8x128xf32>
    %249 = arith.addf %239, %248 : vector<8x128xf32>
    %c119_i32_152 = arith.constant 119 : i32
    %250 = tpu.dynamic_rotate %1 by %c119_i32_152 dim 1 : vector<8x128xf32>, i32 -> vector<8x128xf32>
    %c8_153 = arith.constant 8 : index
    %c0_154 = arith.constant 0 : index
    %c0_155 = arith.constant 0 : index
    %251 = vector.load %arg7[%c8_153, %c0_154, %c0_155] : memref<9x8x1xf32, #tpu.memory_space<vmem>>, vector<1x8x1xf32>
    %252 = vector.shape_cast %251 : vector<1x8x1xf32> to vector<8x1xf32>
    %c8_156 = arith.constant 8 : index
    %c0_157 = arith.constant 0 : index
    %c0_158 = arith.constant 0 : index
    %253 = vector.load %arg4[%c8_156, %c0_157, %c0_158] : memref<9x1x128xf32, #tpu.memory_space<vmem>>, vector<1x1x128xf32>
    %254 = vector.shape_cast %253 : vector<1x1x128xf32> to vector<1x128xf32>
    %255 = vector.broadcast %254 : vector<1x128xf32> to vector<8x128xf32>
    %256 = arith.mulf %255, %250 : vector<8x128xf32>
    %257 = vector.broadcast %252 : vector<8x1xf32> to vector<8x128xf32>
    %258 = arith.mulf %257, %256 : vector<8x128xf32>
    %259 = arith.addf %249, %258 : vector<8x128xf32>
    %c0_159 = arith.constant 0 : index
    %c0_160 = arith.constant 0 : index
    %260 = vector.load %arg8[%c0_159, %c0_160] : memref<8x8xf32, #tpu.memory_space<vmem>>, vector<8x8xf32>
    %cst_161 = arith.constant dense<0.000000e+00> : vector<8x512xf32>
    %261 = tpu.matmul %260, %87, %cst_161 {dimension_numbers = #tpu.dot_dimension_numbers<[1], [0], [0], [1], [0, 0, 1, 1], [], []>} : vector<8x8xf32>, vector<8x512xf32>, vector<8x512xf32> -> vector<8x512xf32>
    %c0_162 = arith.constant 0 : index
    %c0_163 = arith.constant 0 : index
    %262 = vector.load %arg9[%c0_162, %c0_163] : memref<8x1xf32, #tpu.memory_space<vmem>>, vector<8x1xf32>
    %263 = vector.broadcast %262 : vector<8x1xf32> to vector<8x512xf32>
    %264 = arith.addf %261, %263 : vector<8x512xf32>
    %c0_164 = arith.constant 0 : index
    %c0_165 = arith.constant 0 : index
    %265 = vector.load %arg10[%c0_164, %c0_165] : memref<8x8xf32, #tpu.memory_space<vmem>>, vector<8x8xf32>
    %cst_166 = arith.constant dense<0.000000e+00> : vector<8x128xf32>
    %266 = tpu.matmul %265, %173, %cst_166 {dimension_numbers = #tpu.dot_dimension_numbers<[1], [0], [0], [1], [0, 0, 1, 1], [], []>} : vector<8x8xf32>, vector<8x128xf32>, vector<8x128xf32> -> vector<8x128xf32>
    %c0_167 = arith.constant 0 : index
    %c0_168 = arith.constant 0 : index
    %267 = vector.load %arg11[%c0_167, %c0_168] : memref<8x1xf32, #tpu.memory_space<vmem>>, vector<8x1xf32>
    %268 = vector.broadcast %267 : vector<8x1xf32> to vector<8x128xf32>
    %269 = arith.addf %266, %268 : vector<8x128xf32>
    %c0_169 = arith.constant 0 : index
    %c0_170 = arith.constant 0 : index
    %270 = vector.load %arg12[%c0_169, %c0_170] : memref<8x8xf32, #tpu.memory_space<vmem>>, vector<8x8xf32>
    %cst_171 = arith.constant dense<0.000000e+00> : vector<8x128xf32>
    %271 = tpu.matmul %270, %259, %cst_171 {dimension_numbers = #tpu.dot_dimension_numbers<[1], [0], [0], [1], [0, 0, 1, 1], [], []>} : vector<8x8xf32>, vector<8x128xf32>, vector<8x128xf32> -> vector<8x128xf32>
    %c0_172 = arith.constant 0 : index
    %c0_173 = arith.constant 0 : index
    %272 = vector.load %arg13[%c0_172, %c0_173] : memref<8x1xf32, #tpu.memory_space<vmem>>, vector<8x1xf32>
    %273 = vector.broadcast %272 : vector<8x1xf32> to vector<8x128xf32>
    %274 = arith.addf %271, %273 : vector<8x128xf32>
    %c0_174 = arith.constant 0 : index
    %c0_175 = arith.constant 0 : index
    %275 = vector.load %arg14[%c0_174, %c0_175] : memref<256x64xf32, #tpu.memory_space<vmem>>, vector<256x64xf32>
    %c0_176 = arith.constant 0 : index
    %c0_177 = arith.constant 0 : index
    %276 = vector.load %arg15[%c0_176, %c0_177] : memref<8x8xf32, #tpu.memory_space<vmem>>, vector<8x8xf32>
    %c0_178 = arith.constant 0 : index
    %c0_179 = arith.constant 0 : index
    %277 = vector.load %arg16[%c0_178, %c0_179] : memref<8x1xf32, #tpu.memory_space<vmem>>, vector<8x1xf32>
    %278 = vector.extract_strided_slice %264 {offsets = [0, 0], sizes = [8, 256], strides = [1, 1]} : vector<8x512xf32> to vector<8x256xf32>
    %279 = vector.extract_strided_slice %269 {offsets = [0, 0], sizes = [8, 64], strides = [1, 1]} : vector<8x128xf32> to vector<8x64xf32>
    %280 = vector.extract_strided_slice %274 {offsets = [0, 0], sizes = [8, 64], strides = [1, 1]} : vector<8x128xf32> to vector<8x64xf32>
    %cst_180 = arith.constant dense<0.000000e+00> : vector<8x64xf32>
    %281 = tpu.matmul %278, %275, %cst_180 {dimension_numbers = #tpu.dot_dimension_numbers<[1], [0], [0], [1], [0, 0, 1, 1], [], []>} : vector<8x256xf32>, vector<256x64xf32>, vector<8x64xf32> -> vector<8x64xf32>
    %cst_181 = arith.constant dense<0.000000e+00> : vector<8x8xf32>
    %282 = tpu.matmul %281, %279, %cst_181 {dimension_numbers = #tpu.dot_dimension_numbers<[1], [1], [0], [0], [0, 0, 1, 0], [], []>} : vector<8x64xf32>, vector<8x64xf32>, vector<8x8xf32> -> vector<8x8xf32>
    %cst_182 = arith.constant dense<0xFF800000> : vector<8xf32>
    %283 = vector.multi_reduction <maximumf>, %282, %cst_182 [1] : vector<8x8xf32> to vector<8xf32>
    %284 = vector.shape_cast %283 : vector<8xf32> to vector<8x1xf32>
    %285 = vector.broadcast %284 : vector<8x1xf32> to vector<8x8xf32>
    %286 = arith.subf %282, %285 : vector<8x8xf32>
    %287 = math.exp %286 : vector<8x8xf32>
    %cst_183 = arith.constant dense<0.000000e+00> : vector<8xf32>
    %288 = vector.multi_reduction <add>, %287, %cst_183 [1] : vector<8x8xf32> to vector<8xf32>
    %289 = vector.shape_cast %288 : vector<8xf32> to vector<8x1xf32>
    %290 = vector.broadcast %289 : vector<8x1xf32> to vector<8x8xf32>
    %291 = arith.divf %287, %290 : vector<8x8xf32>
    %cst_184 = arith.constant dense<0.000000e+00> : vector<8x8xf32>
    %292 = tpu.matmul %276, %291, %cst_184 {dimension_numbers = #tpu.dot_dimension_numbers<[1], [0], [0], [1], [0, 0, 1, 1], [], []>} : vector<8x8xf32>, vector<8x8xf32>, vector<8x8xf32> -> vector<8x8xf32>
    %cst_185 = arith.constant dense<0.000000e+00> : vector<8x64xf32>
    %293 = tpu.matmul %292, %280, %cst_185 {dimension_numbers = #tpu.dot_dimension_numbers<[1], [0], [0], [1], [0, 0, 1, 1], [], []>} : vector<8x8xf32>, vector<8x64xf32>, vector<8x64xf32> -> vector<8x64xf32>
    %294 = vector.broadcast %277 : vector<8x1xf32> to vector<8x64xf32>
    %295 = arith.addf %293, %294 : vector<8x64xf32>
    %c0_186 = arith.constant 0 : index
    %c0_187 = arith.constant 0 : index
    %296 = vector.load %arg17[%c0_186, %c0_187] : memref<8x128xf32, #tpu.memory_space<vmem>>, vector<8x64xf32>
    tpu.vector_store %arg17[%c0_186, %c0_187], %295 {strides = array<i32>} : memref<8x128xf32, #tpu.memory_space<vmem>>, vector<8x64xf32>,
    %297 = vector.extract_strided_slice %264 {offsets = [0, 256], sizes = [8, 256], strides = [1, 1]} : vector<8x512xf32> to vector<8x256xf32>
    %298 = vector.extract_strided_slice %269 {offsets = [0, 64], sizes = [8, 64], strides = [1, 1]} : vector<8x128xf32> to vector<8x64xf32>
    %299 = vector.extract_strided_slice %274 {offsets = [0, 64], sizes = [8, 64], strides = [1, 1]} : vector<8x128xf32> to vector<8x64xf32>
    %cst_188 = arith.constant dense<0.000000e+00> : vector<8x64xf32>
    %300 = tpu.matmul %297, %275, %cst_188 {dimension_numbers = #tpu.dot_dimension_numbers<[1], [0], [0], [1], [0, 0, 1, 1], [], []>} : vector<8x256xf32>, vector<256x64xf32>, vector<8x64xf32> -> vector<8x64xf32>
    %cst_189 = arith.constant dense<0.000000e+00> : vector<8x8xf32>
    %301 = tpu.matmul %300, %298, %cst_189 {dimension_numbers = #tpu.dot_dimension_numbers<[1], [1], [0], [0], [0, 0, 1, 0], [], []>} : vector<8x64xf32>, vector<8x64xf32>, vector<8x8xf32> -> vector<8x8xf32>
    %cst_190 = arith.constant dense<0xFF800000> : vector<8xf32>
    %302 = vector.multi_reduction <maximumf>, %301, %cst_190 [1] : vector<8x8xf32> to vector<8xf32>
    %303 = vector.shape_cast %302 : vector<8xf32> to vector<8x1xf32>
    %304 = vector.broadcast %303 : vector<8x1xf32> to vector<8x8xf32>
    %305 = arith.subf %301, %304 : vector<8x8xf32>
    %306 = math.exp %305 : vector<8x8xf32>
    %cst_191 = arith.constant dense<0.000000e+00> : vector<8xf32>
    %307 = vector.multi_reduction <add>, %306, %cst_191 [1] : vector<8x8xf32> to vector<8xf32>
    %308 = vector.shape_cast %307 : vector<8xf32> to vector<8x1xf32>
    %309 = vector.broadcast %308 : vector<8x1xf32> to vector<8x8xf32>
    %310 = arith.divf %306, %309 : vector<8x8xf32>
    %cst_192 = arith.constant dense<0.000000e+00> : vector<8x8xf32>
    %311 = tpu.matmul %276, %310, %cst_192 {dimension_numbers = #tpu.dot_dimension_numbers<[1], [0], [0], [1], [0, 0, 1, 1], [], []>} : vector<8x8xf32>, vector<8x8xf32>, vector<8x8xf32> -> vector<8x8xf32>
    %cst_193 = arith.constant dense<0.000000e+00> : vector<8x64xf32>
    %312 = tpu.matmul %311, %299, %cst_193 {dimension_numbers = #tpu.dot_dimension_numbers<[1], [0], [0], [1], [0, 0, 1, 1], [], []>} : vector<8x8xf32>, vector<8x64xf32>, vector<8x64xf32> -> vector<8x64xf32>
    %313 = vector.broadcast %277 : vector<8x1xf32> to vector<8x64xf32>
    %314 = arith.addf %312, %313 : vector<8x64xf32>
    %c0_194 = arith.constant 0 : index
    %c64 = arith.constant 64 : index
    %315 = vector.load %arg17[%c0_194, %c64] : memref<8x128xf32, #tpu.memory_space<vmem>>, vector<8x64xf32>
    tpu.vector_store %arg17[%c0_194, %c64], %314 {strides = array<i32>} : memref<8x128xf32, #tpu.memory_space<vmem>>, vector<8x64xf32>,
    return
  }
  func.func @transform_0(%arg0: i32) -> (i32, i32) {
    %c0_i32 = arith.constant 0 : i32
    %c0_i32_0 = arith.constant 0 : i32
    return %c0_i32, %arg0 : i32, i32
  }
  func.func @transform_1(%arg0: i32) -> (i32, i32) {
    %c0_i32 = arith.constant 0 : i32
    %c0_i32_0 = arith.constant 0 : i32
    return %c0_i32, %arg0 : i32, i32
  }
  func.func @transform_2(%arg0: i32) -> (i32, i32, i32) {
    %c0_i32 = arith.constant 0 : i32
    %c0_i32_0 = arith.constant 0 : i32
    %c0_i32_1 = arith.constant 0 : i32
    %c0_i32_2 = arith.constant 0 : i32
    return %c0_i32, %c0_i32_0, %c0_i32_1 : i32, i32, i32
  }
  func.func @transform_3(%arg0: i32) -> (i32, i32, i32) {
    %c0_i32 = arith.constant 0 : i32
    %c0_i32_0 = arith.constant 0 : i32
    %c0_i32_1 = arith.constant 0 : i32
    %c0_i32_2 = arith.constant 0 : i32
    return %c0_i32, %c0_i32_0, %c0_i32_1 : i32, i32, i32
  }
  func.func @transform_4(%arg0: i32) -> (i32, i32, i32) {
    %c0_i32 = arith.constant 0 : i32
    %c0_i32_0 = arith.constant 0 : i32
    %c0_i32_1 = arith.constant 0 : i32
    %c0_i32_2 = arith.constant 0 : i32
    return %c0_i32, %c0_i32_0, %c0_i32_1 : i32, i32, i32
  }
  func.func @transform_5(%arg0: i32) -> (i32, i32, i32) {
    %c0_i32 = arith.constant 0 : i32
    %c0_i32_0 = arith.constant 0 : i32
    %c0_i32_1 = arith.constant 0 : i32
    %c0_i32_2 = arith.constant 0 : i32
    return %c0_i32, %c0_i32_0, %c0_i32_1 : i32, i32, i32
  }
  func.func @transform_6(%arg0: i32) -> (i32, i32, i32) {
    %c0_i32 = arith.constant 0 : i32
    %c0_i32_0 = arith.constant 0 : i32
    %c0_i32_1 = arith.constant 0 : i32
    %c0_i32_2 = arith.constant 0 : i32
    return %c0_i32, %c0_i32_0, %c0_i32_1 : i32, i32, i32
  }
  func.func @transform_7(%arg0: i32) -> (i32, i32) {
    %c0_i32 = arith.constant 0 : i32
    %c0_i32_0 = arith.constant 0 : i32
    %c0_i32_1 = arith.constant 0 : i32
    return %c0_i32, %c0_i32_0 : i32, i32
  }
  func.func @transform_8(%arg0: i32) -> (i32, i32) {
    %c0_i32 = arith.constant 0 : i32
    %c0_i32_0 = arith.constant 0 : i32
    %c0_i32_1 = arith.constant 0 : i32
    return %c0_i32, %c0_i32_0 : i32, i32
  }
  func.func @transform_9(%arg0: i32) -> (i32, i32) {
    %c0_i32 = arith.constant 0 : i32
    %c0_i32_0 = arith.constant 0 : i32
    %c0_i32_1 = arith.constant 0 : i32
    return %c0_i32, %c0_i32_0 : i32, i32
  }
  func.func @transform_10(%arg0: i32) -> (i32, i32) {
    %c0_i32 = arith.constant 0 : i32
    %c0_i32_0 = arith.constant 0 : i32
    %c0_i32_1 = arith.constant 0 : i32
    return %c0_i32, %c0_i32_0 : i32, i32
  }
  func.func @transform_11(%arg0: i32) -> (i32, i32) {
    %c0_i32 = arith.constant 0 : i32
    %c0_i32_0 = arith.constant 0 : i32
    %c0_i32_1 = arith.constant 0 : i32
    return %c0_i32, %c0_i32_0 : i32, i32
  }
  func.func @transform_12(%arg0: i32) -> (i32, i32) {
    %c0_i32 = arith.constant 0 : i32
    %c0_i32_0 = arith.constant 0 : i32
    %c0_i32_1 = arith.constant 0 : i32
    return %c0_i32, %c0_i32_0 : i32, i32
  }
  func.func @transform_13(%arg0: i32) -> (i32, i32) {
    %c0_i32 = arith.constant 0 : i32
    %c0_i32_0 = arith.constant 0 : i32
    %c0_i32_1 = arith.constant 0 : i32
    return %c0_i32, %c0_i32_0 : i32, i32
  }
  func.func @transform_14(%arg0: i32) -> (i32, i32) {
    %c0_i32 = arith.constant 0 : i32
    %c0_i32_0 = arith.constant 0 : i32
    %c0_i32_1 = arith.constant 0 : i32
    return %c0_i32, %c0_i32_0 : i32, i32
  }
  func.func @transform_15(%arg0: i32) -> (i32, i32) {
    %c0_i32 = arith.constant 0 : i32
    %c0_i32_0 = arith.constant 0 : i32
    %c0_i32_1 = arith.constant 0 : i32
    return %c0_i32, %c0_i32_0 : i32, i32
  }
  func.func @transform_16(%arg0: i32) -> (i32, i32) {
    %c0_i32 = arith.constant 0 : i32
    %c0_i32_0 = arith.constant 0 : i32
    return %c0_i32, %arg0 : i32, i32
  }
}

</mosaic_0001>

<bundles_post_ra>
// kernel: tpu_custom_call.1
= control target key start
LH: loop header
LB: loop body
LE: loop exit
PB: predicated region body
PF: predicated region fallthrough
CT: control target
= control target key end

     0   :  { %s2967_s0 = inlined_call_operand.vmem [shape: f32[8,512], index: 0, kind: input, shape index: {}]   ;;  %s2968_s1 = inlined_call_operand.vmem [shape: f32[8,128], index: 1, kind: input, shape index: {}]   ;;  %s2969_s2 = inlined_call_operand.vmem [shape: f32[9,1,512], index: 2, kind: input, shape index: {}]   ;;  %s2970_s3 = inlined_call_operand.vmem [shape: f32[9,1,128], index: 3, kind: input, shape index: {}]   ;;  %s2971_s4 = inlined_call_operand.vmem [shape: f32[9,8,1], index: 4, kind: input, shape index: {}]   ;;  %s2972_s5 = inlined_call_operand.vmem [shape: f32[9,8,1], index: 5, kind: input, shape index: {}]   ;;  %s2973_s6 = inlined_call_operand.vmem [shape: f32[9,8,1], index: 6, kind: input, shape index: {}]   ;;  %s2974_s7 = inlined_call_operand.vmem [shape: f32[8,8], index: 7, kind: input, shape index: {}]   ;;  %s2975_s8 = inlined_call_operand.vmem [shape: f32[8,1], index: 8, kind: input, shape index: {}]   ;;  %s2976_s9 = inlined_call_operand.vmem [shape: f32[8,8], index: 9, kind: input, shape index: {}]   ;;  %s2977_s10 = inlined_call_operand.vmem [shape: f32[8,1], index: 10, kind: input, shape index: {}]   ;;  %s2978_s11 = inlined_call_operand.vmem [shape: f32[8,8], index: 11, kind: input, shape index: {}]   ;;  %s2979_s12 = inlined_call_operand.vmem [shape: f32[8,1], index: 12, kind: input, shape index: {}]   ;;  %s2980_s13 = inlined_call_operand.vmem [shape: f32[256,64], index: 13, kind: input, shape index: {}]   ;;  %s2981_s14 = inlined_call_operand.vmem [shape: f32[8,8], index: 14, kind: input, shape index: {}]   ;;  %s2982_s15 = inlined_call_operand.vmem [shape: f32[8,1], index: 15, kind: input, shape index: {}]   ;;  %s2983_s16 = inlined_call_operand.hbm [shape: f32[8,128], index: 16, kind: output, shape index: {}]  }
   0x1   :  { %2999 = sst [smem:[#allocation15_spill]] %s2967_s0 }
   0x2   :  { %v1745_v0 = vld [vmem:[%s2971_s4 + $0x10] sm:$0xff]  ;;  %v74_v1 = vld [vmem:[%s2971_s4] sm:$0xff]  ;;  %v2044_v2 = vmov 0   ;;  %v1743_v3 = vld [vmem:[%s2971_s4 + $0x8] sm:$0xff]  ;;  %s3000_s29 = sld [smem:[#allocation15_spill]]  ;;  %s2045_s30 = smov 17  }
   0x3   :  { %2011 = vset.pattern.permute.xlu1 %v2044_v2  ;;  %2010 = vset.pattern.permute.xlu0 %v2044_v2  ;;  %s2046_s18 = smov 16   ;;  %v1747_v6 = vld [vmem:[%s2971_s4 + $0x18] sm:$0xff] }
   0x4   :  { %213 = vperm.xlu1 %2011, %v1745_v0   ;;  %103 = vperm.xlu0 %2010, %v74_v1  }
   0x8   :  { %v2160_v4 = vld [vmem:[%s3000_s29] sm:$0xff]  ;;  %158 = vperm.xlu0 %2010, %v1743_v3   ;;  %v2167_v5 = vld [vmem:[%s3000_s29 + $0x8] sm:$0xff] }
   0x9   :  { %59 = vrot.lane.b32.xlu1 %v2160_v4, %s2045_s30 }
   0xc   :  { %61 = vrot.lane.b32.xlu0 %v2167_v5, %s2045_s30 }
   0xd   :  { %114 = vrot.lane.b32.xlu1 %v2160_v4, %s2046_s18 }
   0xe   :  { %21 = vsyncpa [#allocation3], 0  ;;  %v2181_v7 = vld [vmem:[%s3000_s29 + $0x18] sm:$0xff]  ;;  %s2047_s23 = smov 15   ;;  %v1749_v8 = vld [vmem:[%s2971_s4 + $0x20] sm:$0xff]  ;;  %s2048_s26 = smov 1   ;;  %v67_v50 = vlaneseq }
   0xf   :  { %v1750_v9 = vld [vmem:[%s2971_s4 + $0x28] sm:$0xff]  ;;  %v1752_v10 = vld [vmem:[%s2971_s4 + $0x30] sm:$0xff]  ;;  %s2049_s19 = smov 127   ;;  %v1754_v12 = vld [vmem:[%s2971_s4 + $0x38] sm:$0xff]  ;;  %s2050_s25 = smov 113   ;;  %v2985_v19 = vmov 0.0  }
  0x10   :  { %116 = vrot.lane.b32.xlu0 %v2167_v5, %s2046_s18  ;;  %v2213_v11 = vld [vmem:[%s3000_s29 + $0x10] sm:$0xff]  ;;  %v1756_v13 = vld [vmem:[%s2971_s4 + $0x40] sm:$0xff]  ;;  %s2051_s29 = smov 112   ;;  %s2052_s0 = smov 111   ;;  %v1759_v15 = vld [vmem:[%s2972_s5 + $0x8] sm:$0xff]  ;;  %836 = vmatprep.mubr.f32.mxu0 %v2985_v19  ;;  %v2360_v53 = vshrl.u32 %v67_v50, 7 }
  0x11   :  { %268 = vperm.xlu1 %2011, %v1747_v6   ;;  %v516_v14 = vld [vmem:[%s2972_s5] sm:$0xff]  ;;  %v1762_v16 = vld [vmem:[%s2972_s5 + $0x10] sm:$0xff]  ;;  %v1765_v17 = vld [vmem:[%s2972_s5 + $0x18] sm:$0xff]  ;;  %907 = vmatprep.mubr.f32.mxu1 %v2985_v19  ;;  %s2054_s20 = smov 9   ;;  %s2055_s24 = smov 8   ;;  %v2366_v56 = vand.u32 127, %v67_v50 }
  0x12   :  { %v2258_v18 = vld [vmem:[%s2968_s1] sm:$0xff]  ;;  %v1769_v21 = vld [vmem:[%s2972_s5 + $0x28] sm:$0xff]  ;;  %s2056_s28 = smov 7   ;;  %v1772_v22 = vld [vmem:[%s2972_s5 + $0x30] sm:$0xff]  ;;  %s2057_s27 = smov 121   ;;  %v2374_v58 = vsub.s32 1, %v2360_v53 }
  0x13   :  { %v1768_v20 = vld [vmem:[%s2972_s5 + $0x20] sm:$0xff]  ;;  %v1775_v23 = vld [vmem:[%s2972_s5 + $0x38] sm:$0xff]  ;;  %s2058_s1 = smov 120   ;;  %v1781_v27 = vld [vmem:[%s2973_s6 + $0x8] sm:$0xff]  ;;  %vm122_vm0 = vcmp.lt.s32.totalorder %v2366_v56, 16  ;;  %vm69_vm1 = vcmp.lt.s32.totalorder %v2366_v56, 17 }
  0x14   :  { %65 = vrot.lane.b32.xlu0 %v2181_v7, %s2045_s30  ;;  %v1778_v24 = vld [vmem:[%s2972_s5 + $0x40] sm:$0xff]  ;;  %v1782_v28 = vld [vmem:[%s2973_s6 + $0x10] sm:$0xff]  ;;  %v1783_v29 = vld [vmem:[%s2973_s6 + $0x18] sm:$0xff]  ;;  %vm177_vm2 = vcmp.lt.s32.totalorder %v2366_v56, 15  ;;  %v2397_v1 = vsub.s32 0, %v2360_v53  ;;  %vm232_vm3 = vcmp.lt.s32.totalorder %v2366_v56, 1 }
  0x15   :  { %120 = vrot.lane.b32.xlu1 %v2181_v7, %s2046_s18  ;;  %v762_v25 = vld [vmem:[%s2975_s8] sm:$0xff]  ;;  %v1785_v31 = vld [vmem:[%s2973_s6 + $0x28] sm:$0xff]  ;;  %v1786_v32 = vld [vmem:[%s2973_s6 + $0x30] sm:$0xff]  ;;  %vm302_vm4 = vcmp.lt.s32.totalorder %v2366_v56, 127  ;;  %vm357_vm5 = vcmp.lt.s32.totalorder %v2366_v56, 113  ;;  %vm412_vm6 = vcmp.lt.s32.totalorder %v2366_v56, 112 }
  0x16   :  { %v681_v26 = vld [vmem:[%s2973_s6] sm:$0xff]  ;;  %v1787_v33 = vld [vmem:[%s2973_s6 + $0x38] sm:$0xff]  ;;  %v2385_v60 = vld [vmem:[%s2969_s2 + $0x8] sm:$0xf]  ;;  %vm467_vm7 = vcmp.lt.s32.totalorder %v2366_v56, 111  ;;  %vm768_vm8 = vcmask 64512  }
  0x17   :  { %v1784_v30 = vld [vmem:[%s2973_s6 + $0x20] sm:$0xff]  ;;  %v2402_v2 = vld [vmem:[%s2969_s2 + $0xc] sm:$0xf]  ;;  %v194_v6 = vrot.slane %v2385_v60, %v2374_v58  ;;  %vm2060_vm9 = vmmov 0   ;;  %vm1178_vm10 = vcmask 523264   ;;  %vm1727_vm11 = vcmask 1048064  }
  0x18   :  { %169 = vrot.lane.b32.xlu0 %v2160_v4, %s2047_s23  ;;  %v1788_v36 = vld [vmem:[%s2973_s6 + $0x40] sm:$0xff] }
  0x19   :  { %171 = vrot.lane.b32.xlu1 %v2167_v5, %s2047_s23  ;;  %v915_v39 = vld [vmem:[%s2977_s10] sm:$0xff] }
  0x1a   :  { %v2371_v57 = vld [vmem:[%s2969_s2 + $0x4] sm:$0xf]  ;;  %v2380_v59 = vld [vmem:[%s2969_s2] sm:$0xf] }
  0x1b   :  { %v139_v63 = vrot.slane %v2371_v57, %v2374_v58  ;;  %v84_v3 = vrot.slane %v2380_v59, %v2374_v58 }
  0x1c   :  { %283 = vperm.xlu0 %2010, %v1749_v8  }
  0x1d   :  { %175 = vrot.lane.b32.xlu1 %v2181_v7, %s2047_s23 }
  0x20   :  { %224 = vrot.lane.b32.xlu0 %v2160_v4, %s2048_s26 }
  0x21   :  { %226 = vrot.lane.b32.xlu1 %v2167_v5, %s2048_s26 }
  0x24   :  { %338 = vperm.xlu0 %2010, %v1750_v9  }
  0x25   :  { %230 = vrot.lane.b32.xlu1 %v2181_v7, %s2048_s26 }
  0x28   :  { %393 = vperm.xlu0 %2010, %v1752_v10  }
  0x29   :  { %296 = vrot.lane.b32.xlu1 %v2167_v5, %s2049_s19 }
  0x2c   :  { %298 = vrot.lane.b32.xlu0 %v2213_v11, %s2049_s19 }
  0x2d   :  { %448 = vperm.xlu1 %2011, %v1754_v12  }
  0x30   :  { %294 = vrot.lane.b32.xlu0 %v2160_v4, %s2049_s19 }
  0x31   :  { %351 = vrot.lane.b32.xlu1 %v2167_v5, %s2050_s25 }
  0x34   :  { %353 = vrot.lane.b32.xlu0 %v2213_v11, %s2050_s25 }
  0x35   :  { %503 = vperm.xlu1 %2011, %v1756_v13  }
  0x38   :  { %349 = vrot.lane.b32.xlu0 %v2160_v4, %s2050_s25 }
  0x39   :  { %406 = vrot.lane.b32.xlu1 %v2167_v5, %s2051_s29 }
  0x3c   :  { %408 = vrot.lane.b32.xlu0 %v2213_v11, %s2051_s29 }
  0x3d   :  { %404 = vrot.lane.b32.xlu1 %v2160_v4, %s2051_s29 }
  0x40   :  { %461 = vrot.lane.b32.xlu0 %v2167_v5, %s2052_s0 }
  0x41   :  { %463 = vrot.lane.b32.xlu1 %v2213_v11, %s2052_s0 }
  0x44   :  { %459 = vrot.lane.b32.xlu0 %v2160_v4, %s2052_s0 }
  0x45   :  { %527 = vperm.xlu1 %2011, %v516_v14   ;;  %v249_v14 = vrot.slane %v2402_v2, %v2374_v58 }
  0x48   :  { %547 = vperm.xlu0 %2010, %v1759_v15   ;;  %v80_v15 = vrot.slane %v2380_v59, %v2397_v1 }
  0x49   :  { %567 = vperm.xlu1 %2011, %v1762_v16   ;;  %v135_v16 = vrot.slane %v2371_v57, %v2397_v1 }
  0x4c   :  { %587 = vperm.xlu0 %2010, %v1765_v17  }
  0x4d   :  { %514 = vrot.lane.b32.xlu1 %v2258_v18, %s2054_s20 }
  0x50   :  { %532 = vrot.lane.b32.xlu0 %v2258_v18, %s2055_s24 }
  0x51   :  { %596 = vperm.xlu1 %2011, %v1768_v20  }
  0x54   :  { %552 = vrot.lane.b32.xlu0 %v2258_v18, %s2056_s28  ;;  %s2059_s28 = smov 119  }
  0x55   :  { %616 = vperm.xlu1 %2011, %v1769_v21  }
  0x58   :  { %572 = vrot.lane.b32.xlu0 %v2258_v18, %s2048_s26 }
  0x59   :  { %636 = vperm.xlu1 %2011, %v1772_v22  }
  0x5c   :  { %656 = vperm.xlu0 %2010, %v1775_v23  }
  0x5d   :  { %601 = vrot.lane.b32.xlu1 %v2258_v18, %s2049_s19 }
  0x60   :  { %676 = vperm.xlu0 %2010, %v1778_v24   ;;  %v190_v24 = vrot.slane %v2385_v60, %v2397_v1 }
  0x61   :  { %621 = vrot.lane.b32.xlu1 %v2258_v18, %s2057_s27 }
  0x64   :  { %641 = vrot.lane.b32.xlu0 %v2258_v18, %s2058_s1 }
  0x65   :  { %661 = vrot.lane.b32.xlu1 %v2258_v18, %s2059_s28 }
  0x68   :  { %765 = vperm.xlu0 %2010, %v762_v25  }
  0x69   :  { %684 = vperm.xlu1 %2011, %v681_v26  }
  0x6c   :  { %693 = vperm.xlu0 %2010, %v1781_v27  }
  0x6d   :  { %63 = vrot.lane.b32.xlu1 %v2213_v11, %s2045_s30 }
  0x70   :  { %118 = vrot.lane.b32.xlu0 %v2213_v11, %s2046_s18 }
  0x71   :  { %702 = vperm.xlu1 %2011, %v1782_v28  }
  0x74   :  { %173 = vrot.lane.b32.xlu0 %v2213_v11, %s2047_s23 }
  0x75   :  { %711 = vperm.xlu1 %2011, %v1783_v29  }
  0x78   :  { %228 = vrot.lane.b32.xlu0 %v2213_v11, %s2048_s26 }
  0x79   :  { %720 = vperm.xlu1 %2011, %v1784_v30   ;;  %v2445_v30 = vld [vmem:[%s2969_s2 + $0x14] sm:$0xf] }
  0x7a   :  { %v319_v50 = vrot.slane %v2445_v30, %v2374_v58 }
  0x7c   :  { %729 = vperm.xlu0 %2010, %v1785_v31  }
  0x7d   :  { %300 = vrot.lane.b32.xlu1 %v2181_v7, %s2049_s19 }
  0x80   :  { %738 = vperm.xlu0 %2010, %v1786_v32  }
  0x81   :  { %355 = vrot.lane.b32.xlu1 %v2181_v7, %s2050_s25 }
  0x83   :  { %v2326_v34 = vpop.permute.xlu1 %213  ;;  %v2328_v35 = vpop.permute.xlu0 %103 }
  0x84   :  { %747 = vperm.xlu0 %2010, %v1787_v33   ;;  %v245_v33 = vrot.slane %v2402_v2, %v2397_v1 }
  0x85   :  { %410 = vrot.lane.b32.xlu1 %v2181_v7, %s2051_s29 }
  0x87   :  { %v2335_v37 = vpop.permute.xlu0 %158  ;;  %v60_v38 = vpop.permute.xlu1 %59 }
  0x88   :  { %756 = vperm.xlu0 %2010, %v1788_v36  }
  0x89   :  { %465 = vrot.lane.b32.xlu1 %v2181_v7, %s2052_s0 }
  0x8b   :  { %v2342_v40 = vpop.permute.xlu0 %61  ;;  %v115_v41 = vpop.permute.xlu1 %114 }
  0x8c   :  { %918 = vperm.xlu0 %2010, %v915_v39   ;;  %v72_v8 = vsel %vm69_vm1, %v60_v38, %v2342_v40 }
  0x8d   :  { %v98_v20 = vmul.f32 %v84_v3, %v72_v8 }
  0x8f   :  { %v2344_v42 = vpop.permute.xlu0 %116  ;;  %v107_v36 = vmul.f32 %v2328_v35, %v98_v20 }
  0x90   :  { %v2346_v43 = vpop.permute.xlu1 %268  ;;  %v125_v0 = vsel %vm122_vm0, %v115_v41, %v2344_v42 }
  0x91   :  { %v153_v13 = vmul.f32 %v139_v63, %v125_v0 }
  0x93   :  { %v2348_v44 = vpop.permute.xlu0 %65  ;;  %v162_v27 = vmul.f32 %v2335_v37, %v153_v13 }
  0x94   :  { %v2350_v45 = vpop.permute.xlu1 %120  ;;  %v73_v21 = vsel %vm69_vm1, %v2348_v44, %v60_v38 }
  0x95   :  { %v126_v22 = vsel %vm122_vm0, %v2350_v45, %v115_v41  ;;  %v97_v31 = vmul.f32 %v80_v15, %v73_v21  ;;  %v2458_v41 = vld [vmem:[%s2969_s2 + $0x18] sm:$0xf]  ;;  %v166_v3 = vadd.f32 %v162_v27, %v107_v36 }
  0x96   :  { %v152_v32 = vmul.f32 %v135_v16, %v126_v22  ;;  %v315_v22 = vrot.slane %v2445_v30, %v2397_v1 }
  0x97   :  { %v170_v46 = vpop.permute.xlu0 %169  ;;  %v106_v8 = vmul.f32 %v2328_v35, %v97_v31 }
  0x98   :  { %v2352_v47 = vpop.permute.xlu1 %171 }
  0x99   :  { %v180_v9 = vsel %vm177_vm2, %v170_v46, %v2352_v47 }
  0x9a   :  { %v208_v23 = vmul.f32 %v194_v6, %v180_v9  ;;  %v161_v9 = vmul.f32 %v2335_v37, %v152_v32 }
  0x9b   :  { %v2354_v48 = vpop.permute.xlu0 %283 }
  0x9c   :  { %v2356_v49 = vpop.permute.xlu1 %175  ;;  %v217_v38 = vmul.f32 %v2326_v34, %v208_v23  ;;  %v165_v31 = vadd.f32 %v161_v9, %v106_v8 }
  0x9d   :  { %v181_v28 = vsel %vm177_vm2, %v2356_v49, %v170_v46 }
  0x9e   :  { %v207_v46 = vmul.f32 %v190_v24, %v181_v28  ;;  %v221_v15 = vadd.f32 %v217_v38, %v166_v3  ;;  %v2500_v38 = vld [vmem:[%s2969_s2 + $0x20] sm:$0xf] }
  0x9f   :  { %v225_v51 = vpop.permute.xlu0 %224  ;;  %v484_v9 = vrot.slane %v2500_v38, %v2374_v58 }
  0xa0   :  { %v2358_v52 = vpop.permute.xlu1 %226  ;;  %v216_v20 = vmul.f32 %v2326_v34, %v207_v46 }
  0xa1   :  { %v235_v17 = vsel %vm232_vm3, %v225_v51, %v2358_v52 }
  0xa2   :  { %v263_v29 = vmul.f32 %v249_v14, %v235_v17  ;;  %v374_v14 = vrot.slane %v2458_v41, %v2374_v58  ;;  %v2481_v17 = vld [vmem:[%s2969_s2 + $0x1c] sm:$0xf] }
  0xa3   :  { %v2362_v54 = vpop.permute.xlu0 %338  ;;  %v429_v36 = vrot.slane %v2481_v17, %v2374_v58  ;;  %v425_v46 = vrot.slane %v2481_v17, %v2397_v1 }
  0xa4   :  { %v2364_v55 = vpop.permute.xlu1 %230  ;;  %v272_v6 = vmul.f32 %v2346_v43, %v263_v29  ;;  %v370_v29 = vrot.slane %v2458_v41, %v2397_v1 }
  0xa5   :  { %v236_v39 = vsel %vm232_vm3, %v2364_v55, %v225_v51 }
  0xa6   :  { %v262_v13 = vmul.f32 %v245_v33, %v236_v39  ;;  %v276_v27 = vadd.f32 %v272_v6, %v221_v15 }
  0xa7   :  { %v2387_v61 = vpop.permute.xlu0 %393 }
  0xa8   :  { %v297_v62 = vpop.permute.xlu1 %296  ;;  %v271_v32 = vmul.f32 %v2346_v43, %v262_v13 }
  0xab   :  { %v2415_v10 = vpop.permute.xlu0 %298 }
  0xac   :  { %v2417_v12 = vpop.permute.xlu1 %448  ;;  %v304_v51 = vsel %vm302_vm4, %v297_v62, %v2415_v10 }
  0xad   :  { %v333_v21 = vmul.f32 %v319_v50, %v304_v51  ;;  %v220_v50 = vadd.f32 %v216_v20, %v165_v31 }
  0xaf   :  { %v2436_v25 = vpop.permute.xlu0 %294  ;;  %v342_v3 = vmul.f32 %v2362_v54, %v333_v21  ;;  %v286_v21 = vmul.f32 %v2354_v48, %v2160_v4 }
  0xb0   :  { %v352_v26 = vpop.permute.xlu1 %351  ;;  %v305_v28 = vsel %vm302_vm4, %v2436_v25, %v297_v62  ;;  %v287_v62 = vmul.f32 %v2354_v48, %v2167_v5 }
  0xb1   :  { %v332_v6 = vmul.f32 %v315_v22, %v305_v28 }
  0xb2   :  { %v291_v13 = vadd.f32 %v287_v62, %v276_v27  ;;  %v480_v27 = vrot.slane %v2500_v38, %v2397_v1 }
  0xb3   :  { %v2463_v63 = vpop.permute.xlu0 %353  ;;  %v341_v22 = vmul.f32 %v2362_v54, %v332_v6 }
  0xb4   :  { %v2465_v0 = vpop.permute.xlu1 %503  ;;  %v359_v16 = vsel %vm357_vm5, %v352_v26, %v2463_v63 }
  0xb5   :  { %3001 = vst [vmem:[#allocation5_spill] sm:$0xff] %v2465_v0  ;;  %v388_v33 = vmul.f32 %v374_v14, %v359_v16  ;;  %v275_v14 = vadd.f32 %v271_v32, %v220_v50 }
  0xb7   :  { %v2486_v23 = vpop.permute.xlu0 %349  ;;  %v397_v15 = vmul.f32 %v2387_v61, %v388_v33 }
  0xb8   :  { %v407_v24 = vpop.permute.xlu1 %406  ;;  %v360_v39 = vsel %vm357_vm5, %v2486_v23, %v352_v26 }
  0xb9   :  { %v387_v16 = vmul.f32 %v370_v29, %v360_v39  ;;  %v290_v29 = vadd.f32 %v286_v21, %v275_v14 }
  0xbb   :  { %v2510_v51 = vpop.permute.xlu0 %408  ;;  %v396_v32 = vmul.f32 %v2387_v61, %v387_v16  ;;  %v2547_v16 = vld [vmem:[%s2974_s7] sm:$0xff] }
  0xbc   :  { %3002 = vst [vmem:[#allocation6_spill] sm:$0xff] %v2510_v51  ;;  %v2512_v8 = vpop.permute.xlu1 %404  ;;  %v414_v5 = vsel %vm412_vm6, %v407_v24, %v2510_v51  ;;  %v346_v51 = vadd.f32 %v342_v3, %v291_v13  ;;  %3003 = vst [vmem:[#allocation7_spill] sm:$0xff] %v2547_v16 }
  0xbd   :  { %v415_v26 = vsel %vm412_vm6, %v2512_v8, %v407_v24  ;;  %v443_v20 = vmul.f32 %v429_v36, %v414_v5  ;;  %v345_v36 = vadd.f32 %v341_v22, %v290_v29  ;;  %v3004_v22 = vmov 0.0   ;;  %v1764_v29 = vld [vmem:[%s2970_s3 + $0x2] ss:$0 sm:$0xff] }
  0xbe   :  { %v442_v28 = vmul.f32 %v425_v46, %v415_v26  ;;  %v401_v33 = vadd.f32 %v397_v15, %v346_v51 }
  0xbf   :  { %v462_v31 = vpop.permute.xlu0 %461  ;;  %v452_v24 = vmul.f32 %v2417_v12, %v443_v20  ;;  %v400_v26 = vadd.f32 %v396_v32, %v345_v36 }
  0xc0   :  { %v2527_v19 = vpop.permute.xlu1 %463  ;;  %v451_v62 = vmul.f32 %v2417_v12, %v442_v28  ;;  %v1761_v28 = vld [vmem:[%s2970_s3 + $0x1] ss:$0 sm:$0xff] }
  0xc1   :  { %v469_v58 = vsel %vm467_vm7, %v462_v31, %v2527_v19  ;;  %v456_v50 = vadd.f32 %v452_v24, %v401_v33 }
  0xc2   :  { %v498_v4 = vmul.f32 %v484_v9, %v469_v58  ;;  %v455_v51 = vadd.f32 %v451_v62, %v400_v26 }
  0xc3   :  { %v2537_v39 = vpop.permute.xlu0 %459 }
  0xc4   :  { %v528_v46 = vpop.permute.xlu1 %527  ;;  %v507_v3 = vmul.f32 %v2465_v0, %v498_v4  ;;  %v470_v6 = vsel %vm467_vm7, %v2537_v39, %v462_v31  ;;  %v1758_v31 = vld [vmem:[%s2970_s3] ss:$0 sm:$0xff] }
  0xc5   :  { %v497_v5 = vmul.f32 %v480_v27, %v470_v6 }
  0xc6   :  { %v511_v1 = vadd.f32 %v507_v3, %v456_v50  ;;  %v1767_v50 = vld [vmem:[%s2970_s3 + $0x3] ss:$0 sm:$0xff] }
  0xc7   :  { %v548_v13 = vpop.permute.xlu0 %547  ;;  %v506_v14 = vmul.f32 %v2465_v0, %v497_v5 }
  0xc8   :  { %772 = vmatprep.subr.mxu0 %v511_v1  ;;  %v568_v9 = vpop.permute.xlu1 %567 }
  0xc9   :  { %v510_v15 = vadd.f32 %v506_v14, %v455_v51  ;;  %v1771_v14 = vld [vmem:[%s2970_s3 + $0x5] ss:$0 sm:$0xff] }
  0xcb   :  { %v588_v20 = vpop.permute.xlu0 %587  ;;  %773 = vmatpush1.msra.mxu0 %v510_v15 }
  0xcc   :  { %v515_v21 = vpop.permute.xlu1 %514  ;;  %1789 = vmatmul.mubr.msk.f32.vlgmr.msra.gmra.mrb[0].mxu0 %vm768_vm8, %v2547_v16  ;;  %1887 = vmatprep.subr.mxu0 %v3004_v22 }
  0xcd   :  { %1889 = vmatprep.mubr.msk.f32.mxu0 %vm2060_vm9, %v3004_v22  ;;  %v2565_v32 = vmul.f32 %v1758_v31, %v515_v21 }
  0xcf   :  { %v533_v24 = vpop.permute.xlu0 %532  ;;  %v530_v3 = vmul.f32 %v528_v46, %v2565_v32  ;;  %v1774_v46 = vld [vmem:[%s2970_s3 + $0x6] ss:$0 sm:$0xff] }
  0xd0   :  { %v597_v58 = vpop.permute.xlu1 %596  ;;  %v2560_v27 = vmul.f32 %v1761_v28, %v533_v24 }
  0xd2   :  { %v550_v36 = vmul.f32 %v548_v13, %v2560_v27 }
  0xd3   :  { %v553_v4 = vpop.permute.xlu0 %552 }
  0xd4   :  { %v617_v33 = vpop.permute.xlu1 %616  ;;  %v2568_v62 = vmul.f32 %v1764_v29, %v553_v4  ;;  %v551_v26 = vadd.f32 %v550_v36, %v530_v3 }
  0xd6   :  { %v570_v6 = vmul.f32 %v568_v9, %v2568_v62  ;;  %v599_v9 = vmul.f32 %v597_v58, %v2258_v18 }
  0xd7   :  { %v573_v5 = vpop.permute.xlu0 %572 }
  0xd8   :  { %v637_v1 = vpop.permute.xlu1 %636  ;;  %v2575_v51 = vmul.f32 %v1767_v50, %v573_v5  ;;  %v571_v13 = vadd.f32 %v570_v6, %v551_v26  ;;  %v1780_v6 = vld [vmem:[%s2970_s3 + $0x8] ss:$0 sm:$0xff] }
  0xda   :  { %v590_v15 = vmul.f32 %v588_v20, %v2575_v51  ;;  %v1777_v20 = vld [vmem:[%s2970_s3 + $0x7] ss:$0 sm:$0xff] }
  0xdb   :  { %v657_v21 = vpop.permute.xlu0 %656 }
  0xdc   :  { %v602_v28 = vpop.permute.xlu1 %601  ;;  %v591_v31 = vadd.f32 %v590_v15, %v571_v13 }
  0xdd   :  { %v2581_v24 = vmul.f32 %v1771_v14, %v602_v28 }
  0xde   :  { %v600_v36 = vadd.f32 %v599_v9, %v591_v31  ;;  %v1090_v31 = vld [vmem:[%s2980_s13 + $0x80] sm:$0xff] }
  0xdf   :  { %v677_v29 = vpop.permute.xlu0 %676  ;;  %v619_v50 = vmul.f32 %v617_v33, %v2581_v24 }
  0xe0   :  { %v622_v4 = vpop.permute.xlu1 %621 }
  0xe1   :  { %v2588_v3 = vmul.f32 %v1774_v46, %v622_v4  ;;  %v620_v58 = vadd.f32 %v619_v50, %v600_v36  ;;  %v1091_v46 = vld [vmem:[%s2980_s13 + $0x88] sm:$0xff]  ;;  %v1074_v4 = vld [vmem:[%s2980_s13] sm:$0xff] }
  0xe3   :  { %v639_v5 = vmul.f32 %v637_v1, %v2588_v3  ;;  %v642_v26 = vpop.permute.xlu0 %641 }
  0xe4   :  { %v662_v14 = vpop.permute.xlu1 %661  ;;  %v2597_v13 = vmul.f32 %v1777_v20, %v642_v26  ;;  %v1092_v20 = vld [vmem:[%s2980_s13 + $0x90] sm:$0xff] }
  0xe5   :  { %v2599_v15 = vmul.f32 %v1780_v6, %v662_v14  ;;  %v640_v33 = vadd.f32 %v639_v5, %v620_v58  ;;  %v1093_v6 = vld [vmem:[%s2980_s13 + $0x98] sm:$0xff]  ;;  %v2625_v5 = vpack.c.bf16 %v1091_v46, %v1090_v31  ;;  %v914_v14 = vld [vmem:[%s2976_s9] sm:$0xff]  ;;  %v2643_v46 = vsub.s32 2, %v2360_v53 }
  0xe6   :  { %3005 = vst [vmem:[#allocation8_spill] sm:$0xff] %v2597_v13  ;;  %v659_v28 = vmul.f32 %v657_v21, %v2597_v13  ;;  %v1075_v21 = vld [vmem:[%s2980_s13 + $0x8] sm:$0xff]  ;;  %v1077_v31 = vld [vmem:[%s2980_s13 + $0x18] sm:$0xff] }
  0xe7   :  { %3006 = vst [vmem:[#allocation9_spill] sm:$0xff] %v2599_v15  ;;  %v2608_v9 = vpop.permute.xlu0 %765  ;;  %v679_v50 = vmul.f32 %v677_v29, %v2599_v15  ;;  %3008 = vst [vmem:[#allocation11_spill] sm:$0xff] %v2625_v5  ;;  %v2630_v58 = vpack.c.bf16 %v1075_v21, %v1074_v4  ;;  %v1094_v4 = vld [vmem:[%s2980_s13 + $0xa0] sm:$0xff]  ;;  %v1095_v21 = vld [vmem:[%s2980_s13 + $0xa8] sm:$0xff] }
  0xe8   :  { %3007 = vst [vmem:[#allocation10_spill] sm:$0xff] %v2608_v9  ;;  %v2610_v1 = vpop.permute.xlu1 %684  ;;  %v660_v36 = vadd.f32 %v659_v28, %v640_v33  ;;  %v2634_v28 = vpack.c.bf16 %v1093_v6, %v1092_v20  ;;  %v1076_v9 = vld [vmem:[%s2980_s13 + $0x10] sm:$0xff]  ;;  %v2666_v22 = vpack.c.bf16 %v1095_v21, %v1094_v4 }
  0xe9   :  { %3009 = vst [vmem:[#allocation12_spill] sm:$0xff] %v2630_v58  ;;  %v1096_v21 = vld [vmem:[%s2980_s13 + $0xb0] sm:$0xff] }
  0xea   :  { %v680_v26 = vadd.f32 %v679_v50, %v660_v36  ;;  %3010 = vst [vmem:[#allocation13_spill] sm:$0xff] %v2634_v28  ;;  %v2646_v36 = vsub.s32 3, %v2360_v53  ;;  %v2657_v50 = vpack.c.bf16 %v1077_v31, %v1076_v9  ;;  %v143_v53 = vrot.slane %v2371_v57, %v2643_v46  ;;  %v1079_v9 = vld [vmem:[%s2980_s13 + $0x28] sm:$0xff] }
  0xeb   :  { %v2632_v33 = vpop.permute.xlu0 %693  ;;  %v88_v31 = vrot.slane %v2380_v59, %v2643_v46 }
  0xec   :  { %v64_v29 = vpop.permute.xlu1 %63  ;;  %1888 = vmatpush3.msra.mxu0 %v680_v26  ;;  %v147_v20 = vrot.slane %v2371_v57, %v2646_v36  ;;  %v92_v57 = vrot.slane %v2380_v59, %v2646_v36 }
  0xed   :  { %1890 = vmatmul.mubr.msk.f32.vlgmr.msra.gmra.mrb[2].mxu0 %vm768_vm8, %v914_v14  ;;  %1928 = vmatprep.subr.bf16.mxu0 %v2625_v5  ;;  %v1078_v14 = vld [vmem:[%s2980_s13 + $0x20] sm:$0xff]  ;;  %v70_v59 = vsel %vm69_vm1, %v64_v29, %v2348_v44  ;;  %v198_v5 = vrot.slane %v2385_v60, %v2643_v46 }
  0xee   :  { %1930 = vmatpush3.bf16.msra.mxu0 %v2630_v58  ;;  %v1097_v58 = vld [vmem:[%s2980_s13 + $0xb8] sm:$0xff] }
  0xef   :  { %v119_v6 = vpop.permute.xlu0 %118  ;;  %1932 = vmatprep.subr.bf16.mxu0 %v2634_v28  ;;  %v2706_v44 = vpack.c.bf16 %v1097_v58, %v1096_v21  ;;  %v1098_v58 = vld [vmem:[%s2980_s13 + $0xc0] sm:$0xff] }
  0xf0   :  { %v2663_v26 = vpop.permute.xlu1 %702  ;;  %v123_v28 = vsel %vm122_vm0, %v119_v6, %v2350_v45  ;;  %v124_v4 = vsel %vm122_vm0, %v2344_v42, %v119_v6  ;;  %v71_v45 = vsel %vm69_vm1, %v2342_v40, %v64_v29  ;;  %v202_v42 = vrot.slane %v2385_v60, %v2646_v36  ;;  %v1080_v40 = vld [vmem:[%s2980_s13 + $0x30] sm:$0xff]  ;;  %v1081_v60 = vld [vmem:[%s2980_s13 + $0x38] sm:$0xff] }
  0xf1   :  { %v2701_v6 = vpack.c.bf16 %v1079_v9, %v1078_v14  ;;  %v154_v16 = vmul.f32 %v143_v53, %v124_v4  ;;  %v155_v15 = vmul.f32 %v147_v20, %v123_v28  ;;  %3011 = vst [vmem:[#allocation14_spill] sm:$0xff] %v2706_v44  ;;  %v99_v29 = vmul.f32 %v88_v31, %v71_v45  ;;  %v1099_v20 = vld [vmem:[%s2980_s13 + $0xc8] sm:$0xff] }
  0xf2   :  { %1934 = vmatpush3.bf16.msra.mxu0 %v2657_v50  ;;  %v100_v14 = vmul.f32 %v92_v57, %v70_v59  ;;  %v253_v31 = vrot.slane %v2402_v2, %v2643_v46  ;;  %v2731_v57 = vpack.c.bf16 %v1081_v60, %v1080_v40  ;;  %v2741_v45 = vpack.c.bf16 %v1099_v20, %v1098_v58 }
  0xf3   :  { %v174_v0 = vpop.permute.xlu0 %173  ;;  %1936 = vmatprep.subr.bf16.mxu0 %v2666_v22  ;;  %v164_v21 = vmul.f32 %v2335_v37, %v155_v15 }
  0xf4   :  { %v2703_v13 = vpop.permute.xlu1 %711  ;;  %v178_v28 = vsel %vm177_vm2, %v174_v0, %v2356_v49  ;;  %v179_v53 = vsel %vm177_vm2, %v2352_v47, %v174_v0  ;;  %v257_v49 = vrot.slane %v2402_v2, %v2646_v36  ;;  %v1082_v47 = vld [vmem:[%s2980_s13 + $0x40] sm:$0xff]  ;;  %v163_v0 = vmul.f32 %v2335_v37, %v154_v16  ;;  %v1083_v2 = vld [vmem:[%s2980_s13 + $0x48] sm:$0xff]  ;;  %v1101_v16 = vld [vmem:[%s2980_s13 + $0xd8] sm:$0xff] }
  0xf5   :  { %v209_v9 = vmul.f32 %v198_v5, %v179_v53  ;;  %v210_v4 = vmul.f32 %v202_v42, %v178_v28  ;;  %v1100_v42 = vld [vmem:[%s2980_s13 + $0xd0] sm:$0xff]  ;;  %v108_v37 = vmul.f32 %v2328_v35, %v99_v29  ;;  %v109_v15 = vmul.f32 %v2328_v35, %v100_v14 }
  0xf6   :  { %1938 = vmatpush3.bf16.msra.mxu0 %v2701_v6  ;;  %v327_v35 = vrot.slane %v2445_v30, %v2646_v36  ;;  %v2767_v29 = vpack.c.bf16 %v1083_v2, %v1082_v47  ;;  %v1102_v47 = vld [vmem:[%s2980_s13 + $0xe0] sm:$0xff]  ;;  %v382_v2 = vrot.slane %v2458_v41, %v2646_v36 }
  0xf7   :  { %v229_v5 = vpop.permute.xlu0 %228  ;;  %1940 = vmatprep.subr.bf16.mxu0 %v2706_v44  ;;  %v218_v28 = vmul.f32 %v2326_v34, %v209_v9  ;;  %v219_v53 = vmul.f32 %v2326_v34, %v210_v4  ;;  %v323_v44 = vrot.slane %v2445_v30, %v2643_v46  ;;  %v167_v14 = vadd.f32 %v163_v0, %v108_v37  ;;  %v1085_v30 = vld [vmem:[%s2980_s13 + $0x58] sm:$0xff]  ;;  %v1103_v0 = vld [vmem:[%s2980_s13 + $0xe8] sm:$0xff] }
  0xf8   :  { %v2738_v59 = vpop.permute.xlu1 %720  ;;  %v233_v40 = vsel %vm232_vm3, %v229_v5, %v2364_v55  ;;  %v234_v60 = vsel %vm232_vm3, %v2358_v52, %v229_v5  ;;  %v2769_v55 = vpack.c.bf16 %v1101_v16, %v1100_v42  ;;  %v1084_v52 = vld [vmem:[%s2980_s13 + $0x50] sm:$0xff]  ;;  %v168_v34 = vadd.f32 %v164_v21, %v109_v15 }
  0xf9   :  { %v264_v58 = vmul.f32 %v253_v31, %v234_v60  ;;  %v265_v20 = vmul.f32 %v257_v49, %v233_v40  ;;  %v378_v5 = vrot.slane %v2458_v41, %v2643_v46  ;;  %v222_v42 = vadd.f32 %v218_v28, %v167_v14 }
  0xfa   :  { %1942 = vmatpush3.bf16.msra.mxu0 %v2731_v57  ;;  %v223_v16 = vadd.f32 %v219_v53, %v168_v34  ;;  %v433_v37 = vrot.slane %v2481_v17, %v2643_v46  ;;  %v437_v15 = vrot.slane %v2481_v17, %v2646_v36  ;;  %v2805_v40 = vpack.c.bf16 %v1085_v30, %v1084_v52  ;;  %v1086_v17 = vld [vmem:[%s2980_s13 + $0x60] sm:$0xff] }
  0xfb   :  { %v273_v9 = vmul.f32 %v2346_v43, %v264_v58  ;;  %v274_v4 = vmul.f32 %v2346_v43, %v265_v20  ;;  %v730_v31 = vpop.permute.xlu0 %729  ;;  %1944 = vmatprep.subr.bf16.mxu0 %v2741_v45  ;;  %v2807_v60 = vpack.c.bf16 %v1103_v0, %v1102_v47  ;;  %v288_v52 = vmul.f32 %v2354_v48, %v2213_v11 }
  0xfc   :  { %v301_v49 = vpop.permute.xlu1 %300  ;;  %v289_v34 = vmul.f32 %v2354_v48, %v2181_v7 }
  0xfd   :  { %v303_v43 = vsel %vm302_vm4, %v2415_v10, %v301_v49  ;;  %v306_v21 = vsel %vm302_vm4, %v301_v49, %v2436_v25  ;;  %v696_v10 = vmul.f32 %v2632_v33, %v2560_v27  ;;  %v488_v25 = vrot.slane %v2500_v38, %v2643_v46  ;;  %v1087_v27 = vld [vmem:[%s2980_s13 + $0x68] sm:$0xff] }
  0xfe   :  { %1946 = vmatpush3.bf16.msra.mxu0 %v2767_v29  ;;  %v277_v41 = vadd.f32 %v273_v9, %v222_v42  ;;  %v278_v28 = vadd.f32 %v274_v4, %v223_v16  ;;  %v334_v53 = vmul.f32 %v323_v44, %v303_v43  ;;  %v335_v58 = vmul.f32 %v327_v35, %v306_v21 }
  0xff   :  { %v739_v20 = vpop.permute.xlu0 %738  ;;  %1948 = vmatprep.subr.bf16.mxu0 %v2769_v55  ;;  %v687_v33 = vmul.f32 %v2610_v1, %v2565_v32  ;;  %v705_v46 = vmul.f32 %v2663_v26, %v2568_v62  ;;  %v714_v62 = vmul.f32 %v2703_v13, %v2575_v51  ;;  %v492_v1 = vrot.slane %v2500_v38, %v2646_v36  ;;  %v3012_v13 = vld [vmem:[#allocation6_spill] sm:$0xff] }
 0x100   :  { %v356_v14 = vpop.permute.xlu1 %355  ;;  %v343_v26 = vmul.f32 %v2362_v54, %v334_v53  ;;  %v344_v11 = vmul.f32 %v2362_v54, %v335_v58  ;;  %v293_v48 = vadd.f32 %v289_v34, %v278_v28  ;;  %v723_v51 = vmul.f32 %v2738_v59, %v2258_v18  ;;  %v3013_v58 = vld [vmem:[#allocation8_spill] sm:$0xff]  ;;  %v1104_v34 = vld [vmem:[%s2980_s13 + $0xf0] sm:$0xff] }
 0x101   :  { %v358_v44 = vsel %vm357_vm5, %v2463_v63, %v356_v14  ;;  %v361_v35 = vsel %vm357_vm5, %v356_v14, %v2486_v23  ;;  %v697_v32 = vadd.f32 %v696_v10, %v687_v33  ;;  %v2835_v63 = vpack.c.bf16 %v1087_v27, %v1086_v17  ;;  %v3014_v17 = vld [vmem:[#allocation5_spill] sm:$0xff] }
 0x102   :  { %v389_v9 = vmul.f32 %v378_v5, %v358_v44  ;;  %v390_v4 = vmul.f32 %v382_v2, %v361_v35  ;;  %1950 = vmatpush3.bf16.msra.mxu0 %v2805_v40  ;;  %v292_v23 = vadd.f32 %v288_v52, %v277_v41  ;;  %v732_v5 = vmul.f32 %v730_v31, %v2581_v24  ;;  %v3016_v35 = vld [vmem:[#allocation7_spill] sm:$0xff] }
 0x103   :  { %v748_v49 = vpop.permute.xlu0 %747  ;;  %1952 = vmatprep.subr.bf16.mxu0 %v2807_v60  ;;  %v706_v30 = vadd.f32 %v705_v46, %v697_v32  ;;  %v348_v42 = vadd.f32 %v344_v11, %v293_v48  ;;  %v3017_v52 = vmov 0.0   ;;  %v1088_v32 = vld [vmem:[%s2980_s13 + $0x70] sm:$0xff] }
 0x104   :  { %v411_v7 = vpop.permute.xlu1 %410  ;;  %v398_v47 = vmul.f32 %v2387_v61, %v389_v9  ;;  %v399_v54 = vmul.f32 %v2387_v61, %v390_v4  ;;  %v347_v18 = vadd.f32 %v343_v26, %v292_v23  ;;  %v750_v14 = vmul.f32 %v748_v49, %v3013_v58  ;;  %v1105_v9 = vld [vmem:[%s2980_s13 + $0xf8] sm:$0xff]  ;;  %v994_v23 = vld [vmem:[%s2978_s11] sm:$0xff]  ;;  %v3018_v49 = vld [vmem:[#allocation10_spill] sm:$0xff]  ;;  %s2061_s11 = smov 64  }
 0x105   :  { %v413_v38 = vsel %vm412_vm6, %v3012_v13, %v411_v7  ;;  %v416_v36 = vsel %vm412_vm6, %v411_v7, %v2512_v8  ;;  %v715_v21 = vadd.f32 %v714_v62, %v706_v30  ;;  %v741_v8 = vmul.f32 %v739_v20, %v2588_v3  ;;  %v1089_v62 = vld [vmem:[%s2980_s13 + $0x78] sm:$0xff] }
 0x106   :  { %v444_v0 = vmul.f32 %v433_v37, %v413_v38  ;;  %v445_v43 = vmul.f32 %v437_v15, %v416_v36  ;;  %1954 = vmatpush3.bf16.msra.mxu0 %v2835_v63  ;;  %v403_v41 = vadd.f32 %v399_v54, %v348_v42  ;;  %v402_v28 = vadd.f32 %v398_v47, %v347_v18 }
 0x107   :  { %v724_v10 = vadd.f32 %v723_v51, %v715_v21  ;;  %v757_v31 = vpop.permute.xlu0 %756  ;;  %v2877_v4 = vpack.c.bf16 %v1105_v9, %v1104_v34 }
 0x108   :  { %v453_v59 = vmul.f32 %v2417_v12, %v444_v0  ;;  %v466_v2 = vpop.permute.xlu1 %465  ;;  %v454_v16 = vmul.f32 %v2417_v12, %v445_v43 }
 0x109   :  { %v468_v61 = vsel %vm467_vm7, %v2527_v19, %v466_v2  ;;  %v471_v24 = vsel %vm467_vm7, %v466_v2, %v2537_v39  ;;  %v733_v53 = vadd.f32 %v732_v5, %v724_v10  ;;  %v3015_v19 = vld [vmem:[#allocation9_spill] sm:$0xff]  ;;  %1956 = vmatprep.subr.bf16.mxu0 %v2877_v4 }
 0x10a   :  { %v499_v37 = vmul.f32 %v488_v25, %v468_v61  ;;  %v500_v15 = vmul.f32 %v492_v1, %v471_v24  ;;  %v458_v12 = vadd.f32 %v454_v16, %v403_v41  ;;  %v457_v3 = vadd.f32 %v453_v59, %v402_v28 }
 0x10b   :  { %v742_v33 = vadd.f32 %v741_v8, %v733_v53  ;;  %v759_v46 = vmul.f32 %v757_v31, %v3015_v19  ;;  %v2885_v1 = vpack.c.bf16 %v1089_v62, %v1088_v32  ;;  %v919_v30 = vpop.permute.xlu0 %918  ;;  %v995_v31 = vld [vmem:[%s2979_s12] sm:$0xff] }
 0x10c   :  { %v509_v27 = vmul.f32 %v3014_v17, %v500_v15  ;;  %v508_v20 = vmul.f32 %v3014_v17, %v499_v37  ;;  %v1106_v53 = vld [vmem:[%s2981_s14] sm:$0xff] }
 0x10d   :  { %v751_v39 = vadd.f32 %v750_v14, %v742_v33  ;;  %1958 = vmatpush3.bf16.msra.mxu0 %v2885_v1  ;;  %v3019_v14 = vld [vmem:[#allocation11_spill] sm:$0xff]  ;;  %v3022_v33 = vld [vmem:[#allocation14_spill] sm:$0xff] }
 0x10e   :  { %v513_v44 = vadd.f32 %v509_v27, %v458_v12  ;;  %v512_v56 = vadd.f32 %v508_v20, %v457_v3  ;;  %1912 = vmatprep.subr.mxu0 %v3017_v52  ;;  %v3020_v3 = vld [vmem:[#allocation12_spill] sm:$0xff]  ;;  %v3021_v20 = vld [vmem:[#allocation13_spill] sm:$0xff] }
 0x10f   :  { %v760_v25 = vadd.f32 %v759_v46, %v751_v39 }
 0x110   :  { %843 = vmatprep.subr.mxu1 %v513_v44 }
 0x111   :  { %844 = vmatpush1.msra.mxu1 %v512_v56 }
 0x112   :  { %1790 = vmatmul.mubr.msk.f32.vlgmr.msra.gmra.mrb[0].mxu1 %vm768_vm8, %v3016_v35  ;;  %1892 = vmatprep.subr.mxu1 %v3017_v52 }
 0x113   :  { %1893 = vmatpush3.msra.mxu1 %v760_v25  ;;  %1894 = vmatprep.mubr.msk.f32.mxu1 %vm2060_vm9, %v3017_v52 }
 0x114   :  { %1897 = vmatprep.subr.mxu1 %v3017_v52 }
 0x116   :  { %1895 = vmatmul.mubr.msk.f32.vlgmr.msra.gmra.mrb[2].mxu1 %vm768_vm8, %v994_v23 }
 0x117   :  { %1899 = vmatprep.mubr.msk.f32.mxu1 %vm2060_vm9, %v3017_v52 }
 0x19f   :  { %v838_v26 = vpop.f32.mrb[0].mxu0 }
 0x1a0   :  { %v840_v11 = vpop.f32.mrb[1].mxu0  ;;  %v839_v48 = vadd.f32 %v838_v26, %v3018_v49 }
 0x1a1   :  { %v841_v7 = vadd.f32 %v840_v11, %v3018_v49 }
 0x1a3   :  { %1172 = vmatprep.mubr.f32.mxu0 %v841_v7 }
 0x1a4   :  { %1173 = vmatmul.mubr.f32.vlgmr.msra.gmra.mrb[4].mxu0 %v839_v48 }
 0x1a5   :  { %1914 = vmatprep.mubr.msk.f32.mxu0 %vm2060_vm9, %v3017_v52 }
 0x1c0   :  { %v990_v51 = vpop.f32.mrb[2].mxu0 }
 0x1c1   :  { %v991_v13 = vadd.f32 %v990_v51, %v919_v30  ;;  %v1891_v38 = vpop.f32.mrb[3].mxu0 }
 0x1c3   :  { %1898 = vmatpush3.xpose.msk.msra.mxu1 %vm1178_vm10, %v991_v13 }
 0x1c4   :  { %1902 = vmatprep.subr.mxu1 %v3017_v52 }
 0x1e5   :  { %v909_v36 = vpop.f32.mrb[0].mxu1 }
 0x1e6   :  { %v911_v47 = vpop.f32.mrb[1].mxu1 }
 0x1e7   :  { %v912_v12 = vadd.f32 %v911_v47, %v3018_v49 }
 0x1e9   :  { %v1070_v54 = vpop.f32.mrb[2].mxu1 }
 0x1ea   :  { %v1896_v0 = vpop.f32.mrb[3].mxu1 }
 0x277   :  { %v1837_v43 = vpop.f32.mrb[4].mxu0 }
 0x278   :  { %v1838_v21 = vpop.f32.mrb[5].mxu0 }
 0x279   :  { %v1839_v5 = vadd.f32 %v1838_v21, %v1837_v43 }
 0x27b   :  { %1900 = vmatmul.mubr.msk.f32.vlgmr.msra.gmra.mrb[4].mxu1 %vm1178_vm10, %v1839_v5 }
 0x27c   :  { %1904 = vmatprep.mubr.msk.f32.mxu1 %vm2060_vm9, %v3017_v52 }
 0x34e   :  { %v1251_v18 = vpop.f32.mrb[4].mxu1 }
 0x34f   :  { %v1901_v59 = vpop.f32.mrb[5].mxu1  ;;  %v1255_v2 = vsel %vm768_vm8, %v1251_v18, -inf }
 0x350   :  { %1256 = vmax.xlane.f32.xlu1 %v1255_v2 }
 0x361   :  { %1488 = vrot.lane.b32.xlu1 %v991_v13, %s2061_s11 }
 0x3dd   :  { %v1257_v42 = vpop.xlane.xlu1 %1256 }
 0x3de   :  { %v1258_v16 = vsub.f32 %v1251_v18, %v1257_v42 }
 0x3e0   :  { %v1259_v10 = vmul.f32 1.442695, %v1258_v16 }
 0x3e1   :  { %v1489_v8 = vpop.permute.xlu1 %1488 }
 0x3e2   :  { %2012 = vpow2.f32 %v1259_v10  ;;  %1913 = vmatpush3.xpose.msk.msra.mxu0 %vm1178_vm10, %v1489_v8 }
 0x3e3   :  { %1917 = vmatprep.subr.mxu0 %v3017_v52 }
 0x3ec   :  { %v2013_v61 = vpop.eup %2012 }
 0x3ed   :  { %v1261_v24 = vsel %vm768_vm8, %v2013_v61, 0.0 }
 0x3ee   :  { %1262 = vadd.xlane.f32.xlu0 %v1261_v24 }
 0x404   :  { %998 = vperm.xlu0 %2010, %v995_v31  }
 0x47b   :  { %v1263_v37 = vpop.xlane.xlu0 %1262 }
 0x47c   :  { %2014 = vrcp.f32 %v1263_v37 }
 0x483   :  { %v999_v41 = vpop.permute.xlu0 %998 }
 0x484   :  { %v1071_v58 = vadd.f32 %v1070_v54, %v999_v41 }
 0x486   :  { %v2015_v15 = vpop.eup %2014 }
 0x487   :  { %v1265_v28 = vmul.f32 %v2015_v15, %v2013_v61 }
 0x489   :  { %1903 = vmatpush3.msra.mxu1 %v1265_v28 }
 0x48a   :  { %1905 = vmatmul.mubr.msk.f32.vlgmr.msra.gmra.mrb[6].mxu1 %vm768_vm8, %v1106_v53  ;;  %1907 = vmatprep.subr.mxu1 %v3017_v52 }
 0x48b   :  { %1908 = vmatpush3.msra.mxu1 %v1071_v58  ;;  %1909 = vmatprep.mubr.msk.f32.mxu1 %vm2060_vm9, %v3017_v52 }
 0x48c   :  { %1960 = vmatprep.subr.bf16.mxu1 %v3019_v14 }
 0x55d   :  { %v1335_v17 = vpop.f32.mrb[6].mxu1 }
 0x55e   :  { %v1906_v27 = vpop.f32.mrb[7].mxu1  ;;  %1910 = vmatmul.mubr.msk.f32.vlgmr.msra.gmra.mrb[8].mxu1 %vm768_vm8, %v1335_v17 }
 0x55f   :  { %1962 = vmatpush3.bf16.msra.mxu1 %v3020_v3  ;;  %1482 = vmatprep.mubr.f32.mxu1 %v912_v12 }
 0x560   :  { %1964 = vmatprep.subr.bf16.mxu1 %v3021_v20 }
 0x563   :  { %1966 = vmatpush3.bf16.msra.mxu1 %v2657_v50 }
 0x564   :  { %1968 = vmatprep.subr.bf16.mxu1 %v2666_v22  ;;  %v910_v22 = vadd.f32 %v909_v36, %v3018_v49 }
 0x567   :  { %1970 = vmatpush3.bf16.msra.mxu1 %v2701_v6 }
 0x568   :  { %1972 = vmatprep.subr.bf16.mxu1 %v3022_v33 }
 0x56b   :  { %1974 = vmatpush3.bf16.msra.mxu1 %v2731_v57 }
 0x56c   :  { %1976 = vmatprep.subr.bf16.mxu1 %v2741_v45 }
 0x56f   :  { %1978 = vmatpush3.bf16.msra.mxu1 %v2767_v29 }
 0x570   :  { %1980 = vmatprep.subr.bf16.mxu1 %v2769_v55 }
 0x573   :  { %1982 = vmatpush3.bf16.msra.mxu1 %v2805_v40 }
 0x574   :  { %1984 = vmatprep.subr.bf16.mxu1 %v2807_v60 }
 0x577   :  { %1986 = vmatpush3.bf16.msra.mxu1 %v2835_v63  ;;  %v1107_v63 = vld [vmem:[%s2982_s15] sm:$0xff]  ;;  %s2062_s15 = smov [#allocation2]  }
 0x578   :  { %1988 = vmatprep.subr.bf16.mxu1 %v2877_v4  ;;  %s1735_s8 = sshll.u32 %s2062_s15, 4  ;;  %s1736_s8 = int_to_ptr.vmem [resolvable:$true] %s1735_s8 }
 0x579   :  { %s2020_s1 = scalar_lea.vmem %s1736_s8, 128  ;;  %p2025_p1 = scmp.lt.s32.totalorder %s1736_s8, %s1736_s8 }
 0x57a   :  { %p2021_p0 = scmp.ne.s32.totalorder %s1736_s8, %s2020_s1  ;;  %p2026_p2 = scmp.lt.s32.totalorder %s2020_s1, %s2020_s1 }
 0x57b   :  { %1990 = vmatpush3.bf16.msra.mxu1 %v2885_v1 }
 0x57c   :  { %p2027_p3 = por %p2026_p2, %p2025_p1 }
 0x57e   :  { %1483 = vmatmul.mubr.f32.vlgmr.msra.gmra.mrb[10].mxu1 %v910_v22  ;;  %p2028_p4 = pnand %p2027_p3, %p2021_p0 }
 0x631   :  { %v1413_v50 = vpop.f32.mrb[8].mxu1 }
 0x632   :  { %v1911_v6 = vpop.f32.mrb[9].mxu1 }
 0x651   :  { %v1878_v57 = vpop.f32.mrb[10].mxu1 }
 0x652   :  { %v1879_v45 = vpop.f32.mrb[11].mxu1 }
 0x653   :  { %v1880_v29 = vadd.f32 %v1879_v45, %v1878_v57 }
 0x655   :  { %1915 = vmatmul.mubr.msk.f32.vlgmr.msra.gmra.mrb[6].mxu0 %vm1178_vm10, %v1880_v29 }
 0x656   :  { %1919 = vmatprep.mubr.msk.f32.mxu0 %vm2060_vm9, %v3017_v52 }
 0x728   :  { %v1561_v55 = vpop.f32.mrb[6].mxu0 }
 0x729   :  { %v1916_v40 = vpop.f32.mrb[7].mxu0  ;;  %v1565_v60 = vsel %vm768_vm8, %v1561_v55, -inf }
 0x72a   :  { %1566 = vmax.xlane.f32.xlu1 %v1565_v60 }
 0x73b   :  { %1341 = vperm.xlu1 %2011, %v1107_v63  }
 0x7b7   :  { %v1567_v19 = vpop.xlane.xlu1 %1566 }
 0x7b8   :  { %v1568_v46 = vsub.f32 %v1561_v55, %v1567_v19 }
 0x7ba   :  { %v1569_v44 = vmul.f32 1.442695, %v1568_v46 }
 0x7bb   :  { %v1342_v56 = vpop.permute.xlu1 %1341 }
 0x7bc   :  { %2016 = vpow2.f32 %v1569_v44  ;;  %v1414_v39 = vadd.f32 %v1413_v50, %v1342_v56 }
 0x7be   :  { %1417 = vst.msk [vmem:[#allocation2] sm:$0xff] %vm1178_vm10, %v1414_v39 }
 0x7c6   :  { %v2017_v25 = vpop.eup %2016 }
 0x7c7   :  { %v1571_v35 = vsel %vm768_vm8, %v2017_v25, 0.0 }
 0x7c8   :  { %1572 = vadd.xlane.f32.xlu0 %v1571_v35 }
 0x7de   :  { %1647 = vrot.lane.b32.xlu0 %v1071_v58, %s2061_s11 }
 0x855   :  { %v1573_v34 = vpop.xlane.xlu0 %1572 }
 0x856   :  { %2018 = vrcp.f32 %v1573_v34 }
 0x859   :  { %v1648_v32 = vpop.permute.xlu0 %1647 }
 0x860   :  { %v2019_v9 = vpop.eup %2018 }
 0x861   :  { %v1575_v4 = vmul.f32 %v2019_v9, %v2017_v25 }
 0x863   :  { %1918 = vmatpush3.msra.mxu0 %v1575_v4 }
 0x864   :  { %1920 = vmatmul.mubr.msk.f32.vlgmr.msra.gmra.mrb[8].mxu0 %vm768_vm8, %v1106_v53  ;;  %1922 = vmatprep.subr.mxu0 %v3017_v52 }
 0x865   :  { %1923 = vmatpush3.msra.mxu0 %v1648_v32  ;;  %1924 = vmatprep.mubr.msk.f32.mxu0 %vm2060_vm9, %v3017_v52 }
 0x937   :  { %v1642_v62 = vpop.f32.mrb[8].mxu0 }
 0x938   :  { %1925 = vmatmul.mubr.msk.f32.vlgmr.msra.gmra.mrb[10].mxu0 %vm768_vm8, %v1642_v62  ;;  %v1921_v1 = vpop.f32.mrb[9].mxu0 }
 0xa0b   :  { %v1719_v23 = vpop.f32.mrb[10].mxu0 }
 0xa0c   :  { %v1720_v26 = vadd.f32 %v1719_v23, %v1342_v56  ;;  %v1926_v11 = vpop.f32.mrb[11].mxu0 }
 0xa0e   :  { %1724 = vrot.lane.b32.xlu1 %v1720_v26, %s2061_s11 }
 0xa80   :  { %v1725_v49 = vpop.permute.xlu1 %1724 }
 0xa81   :  { %1728 = vst.msk [vmem:[#allocation2] sm:$0xff] %vm1727_vm11, %v1725_v49 }
 0xa82   :  { %2031 = shalt.err (!%p2028_p4)
}
 0xa83   :  { %s2032_s30 = scalar_lea.hbm %s2983_s16, 128 }
 0xa84   :  { %p2033_p5 = scmp.ne.s32.totalorder %s2983_s16, %s2032_s30  ;;  %p2036_p6 = scmp.lt.u32.totalorder %s2032_s30, %s2983_s16 }
 0xa86   :  { %p2038_p7 = pnand %p2036_p6, %p2033_p5 }
 0xa88   :  { %2041 = shalt.err (!%p2038_p7)
}
 0xa89   :  { %1738 = dma.vmem_to_hbm [thread:$0]  %s1736_s8, 128, %s2983_s16, [#allocation3]  }
 0xa8a   :  { %2042 = dma.done.wait [#allocation3], 128  }
 0xa8b   :  { %2043 = vsyncadd [#allocation3], 4294967168 }
 0xa8c   :  { %1742 = vsyncpa [#allocation3], 1 }

</bundles_post_ra>
